<compile_context>
chip_gen: v6e
topology: v6e:2x2x1
jax: 0.10.0
libtpu: 0.0.40
codegen_flags: <defaults>
</compile_context>

<pallas_src>
import jax
import jax.numpy as jnp
from jax.experimental import pallas as pl
from jax.experimental.pallas import tpu as pltpu


# ----------------------------------------------------------------------------
# Kernel
# ----------------------------------------------------------------------------
def amelimatch_kernel(m_txt_ref, m_txt_mask_ref,
                      e_txt_ref, e_txt_mask_ref,
                      m_img_ref, e_img_ref,
                      ent_mask_ref,
                      wt_ref, bt_bias_ref, wi_ref, bi_bias_ref,
                      w1t_ref, w1i_ref, b1_ref, w2_ref,
                      b2_ref,
                      out_ref):
    Bt, L, Dt = m_txt_ref.shape
    C = e_txt_ref.shape[1]
    Di = m_img_ref.shape[-1]
    Dm = wt_ref.shape[-1]
    H = w1t_ref.shape[-1]

    mt = m_txt_ref[...]                                    # [Bt, L, Dt]
    et = e_txt_ref[...]                                    # [Bt, C, L, Dt]
    mi = m_img_ref[...].reshape(Bt, Di)                    # [Bt, Di]
    ei = e_img_ref[...].reshape(Bt * C, Di)                # [Bt*C, Di]
    mtm = m_txt_mask_ref[...]                              # [Bt, 1, L]  lane-dense, f32
    etm = e_txt_mask_ref[...]                              # [Bt, C, L]  lane-dense, f32
    emask = ent_mask_ref[...].reshape(Bt, C)               # [Bt, C]

    # ---- text matcher: masked token sums (division deferred to the projected
    #      Dm-wide rows).  The mask relayout (lanes -> sublanes) is on a tiny
    #      tensor.  The multiply runs in the embed dtype so a bf16 feed keeps
    #      the big temporary half-size on v6e/v7x; feed f32 embeds on v5e if
    #      its missing bf16 VALU matters.
    m_sum = jnp.sum(mt * mtm.reshape(Bt, L, 1).astype(mt.dtype), axis=1)       # [Bt, Dt]
    e_sum = jnp.sum(et * etm.reshape(Bt, C, L, 1).astype(et.dtype), axis=2)    # [Bt, C, Dt]
    inv_m = 1.0 / jnp.maximum(jnp.sum(mtm, axis=2), 1.0)                       # [Bt, 1]
    inv_e = 1.0 / jnp.maximum(jnp.sum(etm, axis=2), 1.0)                       # [Bt, C]

    # ---- one stacked projection matmul per modality (entity rows first so the
    #      split at row Bt*C stays sublane-aligned when Bt*C % 8 == 0).
    txt_lhs = jnp.concatenate([e_sum.reshape(Bt * C, Dt), m_sum], axis=0)      # [Bt*(C+1), Dt]
    txt_proj = jnp.dot(txt_lhs.astype(wt_ref.dtype), wt_ref[...],
                       preferred_element_type=jnp.float32)                     # [Bt*(C+1), Dm]
    e_proj = (txt_proj[:Bt * C].reshape(Bt, C, Dm) * inv_e[:, :, None]
              + bt_bias_ref[...])                                              # [Bt, C, Dm]
    m_proj = txt_proj[Bt * C:] * inv_m + bt_bias_ref[...]                      # [Bt, Dm]
    text_match = (m_proj[:, None, :] * e_proj).reshape(Bt * C, Dm)

    img_lhs = jnp.concatenate([ei, mi], axis=0)                                # [Bt*(C+1), Di]
    img_proj = jnp.dot(img_lhs.astype(wi_ref.dtype), wi_ref[...],
                       preferred_element_type=jnp.float32) + bi_bias_ref[...]
    ei_proj = img_proj[:Bt * C].reshape(Bt, C, Dm)
    mi_proj = img_proj[Bt * C:]
    image_match = (mi_proj[:, None, :] * ei_proj).reshape(Bt * C, Dm)

    # ---- cross-modal fuser: split-weight matmuls (no [*, 2*Dm] concat), ReLU.
    h = jnp.maximum(
        jnp.dot(text_match.astype(w1t_ref.dtype), w1t_ref[...],
                preferred_element_type=jnp.float32)
        + jnp.dot(image_match.astype(w1i_ref.dtype), w1i_ref[...],
                  preferred_element_type=jnp.float32)
        + b1_ref[...],
        0.0)                                                                   # [Bt*C, H]

    # ---- N=1 output head as VPU multiply + lane reduce (no M x 1 matmul).
    logits = jnp.sum(h.reshape(Bt, C, H) * w2_ref[...], axis=-1) + b2_ref[0]   # [Bt, C]

    # ---- masked softmax over the candidate (lane) axis.
    neg = jnp.where(emask > 0.0, logits, jnp.full_like(logits, -1e30))
    mx = jnp.max(neg, axis=-1, keepdims=True)
    ex = jnp.exp(neg - mx) * emask
    probs = ex / jnp.maximum(jnp.sum(ex, axis=-1, keepdims=True), 1e-30)
    out_ref[...] = probs.reshape(Bt, 1, C)                                     # lane-dense


# ----------------------------------------------------------------------------
# VMEM-budgeted batch-block selection
# ----------------------------------------------------------------------------
def _ceil_to(x, m):
    return -(-x // m) * m


def _padded_bytes(shape, itemsize):
    """VMEM bytes of a block after (sublane, lane) tile padding."""
    dims = list(shape)
    dims[-1] = _ceil_to(dims[-1], 128)
    if len(dims) >= 2:
        dims[-2] = _ceil_to(dims[-2], 8 * max(1, 4 // itemsize))
    n = 1
    for d in dims:
        n *= d
    return n * itemsize


def _vmem_step_bytes(bt, C, L, Dt, Di, Dm, H, embed_isz, param_isz):
    """Worst-case VMEM for one grid step: double-buffered streamed blocks,
    double-buffered weights, plus in-kernel temporaries (conservatively
    assuming the masked product materializes in f32)."""
    streamed = (
        _padded_bytes((bt, L, Dt), embed_isz)          # mention text embed
        + _padded_bytes((bt, 1, L), 4)                 # mention text mask (lane-dense)
        + _padded_bytes((bt, C, L, Dt), embed_isz)     # entity text embeds (dominant)
        + _padded_bytes((bt, C, L), 4)                 # entity text mask (lane-dense)
        + _padded_bytes((bt, 1, Di), embed_isz)        # mention image embed
        + _padded_bytes((bt, C, Di), embed_isz)        # entity image embeds
        + _padded_bytes((bt, 1, C), 4)                 # entity mask
        + _padded_bytes((bt, 1, C), 4))                # output probs
    weights = (
        _padded_bytes((Dt, Dm), param_isz) + _padded_bytes((Di, Dm), param_isz)
        + 2 * _padded_bytes((Dm, H), param_isz)
        + 2 * _padded_bytes((1, Dm), param_isz)
        + 2 * _padded_bytes((1, H), param_isz))
    rows = bt * (C + 1)
    temps = (
        _padded_bytes((bt, C, L, Dt), 4)               # masked product (worst case, f32)
        + 2 * _padded_bytes((rows, max(Dt, Di)), 4)    # stacked projection inputs
        + 6 * _padded_bytes((rows, max(Dm, H)), 4))    # projections / matches / fuser acts
    return 2 * streamed + 2 * weights + temps


def _choose_batch_block(B, C, step_bytes_fn, budget_bytes):
    divisors = [d for d in range(1, B + 1) if B % d == 0]
    fitting = [d for d in divisors if step_bytes_fn(d) <= budget_bytes] or [1]
    # Prefer the largest block that still leaves >=4 pipelined grid steps
    # (DMA/compute overlap + both TensorCores on v7x); fall back to >=2 steps,
    # then to the largest fitting block.  Prefer bt*C % 8 == 0 (aligned split).
    for min_steps in (4, 2, 1):
        cands = [d for d in fitting if B // d >= min_steps]
        if not cands:
            continue
        aligned = [d for d in cands if (d * C) % 8 == 0]
        return max(aligned) if aligned else max(cands)
    return 1


def _vmem_limit_bytes():
    try:
        physical = int(pltpu.get_tpu_info().vmem_capacity_bytes)
    except Exception:
        physical = 64 * 1024 * 1024        # conservative: v7x has 64 MiB per TensorCore
    return max(32 * 1024 * 1024, physical * 3 // 4)


# ----------------------------------------------------------------------------
# Wrapper
# ----------------------------------------------------------------------------
def amelimatch_forward(mention_text_embed, mention_text_mask,
                       entity_text_embeds, entity_text_mask,
                       mention_image_embed, entity_image_embeds,
                       entity_mask, params, *, batch_block=None):
    B, L, Dt = mention_text_embed.shape
    _, C, _, _ = entity_text_embeds.shape
    Di = mention_image_embed.shape[-1]
    Dm = params["wt"].shape[1]
    H = params["w1"].shape[1]
    assert params["w1"].shape[0] == 2 * Dm

    embed_isz = jnp.dtype(mention_text_embed.dtype).itemsize
    param_isz = jnp.dtype(params["wt"].dtype).itemsize

    vmem_limit = _vmem_limit_bytes()
    budget = int(vmem_limit * 0.8)
    if batch_block is None:
        bt = _choose_batch_block(
            B, C,
            lambda d: _vmem_step_bytes(d, C, L, Dt, Di, Dm, H, embed_isz, param_isz),
            budget)
    else:
        bt = batch_block
    assert B % bt == 0, "batch_block must divide the batch size"
    grid = (B // bt,)

    # Lane-dense masks: no trailing length-1 dims (those pad to 128 lanes in VMEM).
    m_txt_mask = mention_text_mask.reshape(B, 1, L).astype(jnp.float32)
    e_txt_mask = entity_text_mask.reshape(B, C, L).astype(jnp.float32)
    ent_mask = entity_mask.reshape(B, 1, C).astype(jnp.float32)
    m_img = mention_image_embed.reshape(B, 1, Di)

    w1_t = params["w1"][:Dm]                 # [Dm, H]
    w1_i = params["w1"][Dm:]                 # [Dm, H]

    out = pl.pallas_call(
        amelimatch_kernel,
        out_shape=jax.ShapeDtypeStruct((B, 1, C), jnp.float32),
        grid=grid,
        in_specs=[
            pl.BlockSpec((bt, L, Dt), lambda b: (b, 0, 0)),
            pl.BlockSpec((bt, 1, L), lambda b: (b, 0, 0)),
            pl.BlockSpec((bt, C, L, Dt), lambda b: (b, 0, 0, 0)),
            pl.BlockSpec((bt, C, L), lambda b: (b, 0, 0)),
            pl.BlockSpec((bt, 1, Di), lambda b: (b, 0, 0)),
            pl.BlockSpec((bt, C, Di), lambda b: (b, 0, 0)),
            pl.BlockSpec((bt, 1, C), lambda b: (b, 0, 0)),
            pl.BlockSpec((Dt, Dm), lambda b: (0, 0)),
            pl.BlockSpec((1, Dm), lambda b: (0, 0)),
            pl.BlockSpec((Di, Dm), lambda b: (0, 0)),
            pl.BlockSpec((1, Dm), lambda b: (0, 0)),
            pl.BlockSpec((Dm, H), lambda b: (0, 0)),
            pl.BlockSpec((Dm, H), lambda b: (0, 0)),
            pl.BlockSpec((1, H), lambda b: (0, 0)),
            pl.BlockSpec((1, H), lambda b: (0, 0)),
            pl.BlockSpec(memory_space=pltpu.MemorySpace.SMEM),     # b2 scalar
        ],
        out_specs=pl.BlockSpec((bt, 1, C), lambda b: (b, 0, 0)),
        compiler_params=pltpu.CompilerParams(
            dimension_semantics=("parallel",),        # batch blocks are independent
            vmem_limit_bytes=vmem_limit),
    )(mention_text_embed, m_txt_mask, entity_text_embeds, e_txt_mask,
      m_img, entity_image_embeds, ent_mask,
      params["wt"], params["bt"].reshape(1, -1),
      params["wi"], params["bi"].reshape(1, -1),
      w1_t, w1_i, params["b1"].reshape(1, -1),
      params["w2"].reshape(1, -1),
      params["b2"].reshape(1).astype(jnp.float32))
    return out.reshape(B, C)


# ----------------------------------------------------------------------------
# Pure-JAX reference
# ----------------------------------------------------------------------------
def amelimatch_reference(mention_text_embed, mention_text_mask,
                         entity_text_embeds, entity_text_mask,
                         mention_image_embed, entity_image_embeds,
                         entity_mask, params):
    """Pure-JAX mirror of the module math.  Pooling is written project-then-
    scale (Linear is linear, so it is algebraically identical to mean-pool-
    then-project); this keeps the matmul operands identical to the kernel's so
    a tight f32 tolerance stays meaningful."""
    mtm = mention_text_mask.astype(jnp.float32)                     # [B, L]
    etm = entity_text_mask.astype(jnp.float32)                      # [B, C, L]
    m_sum = (mention_text_embed * mtm[..., None]).sum(1)            # [B, Dt]
    e_sum = (entity_text_embeds * etm[..., None]).sum(2)            # [B, C, Dt]
    inv_m = 1.0 / jnp.maximum(mtm.sum(-1, keepdims=True), 1.0)      # [B, 1]
    inv_e = 1.0 / jnp.maximum(etm.sum(-1), 1.0)                     # [B, C]
    m_proj = (m_sum @ params["wt"]) * inv_m + params["bt"]
    e_proj = (e_sum @ params["wt"]) * inv_e[..., None] + params["bt"]
    text_match = m_proj[:, None, :] * e_proj                        # [B, C, Dm]

    mi_proj = mention_image_embed @ params["wi"] + params["bi"]
    ei_proj = entity_image_embeds @ params["wi"] + params["bi"]
    image_match = mi_proj[:, None, :] * ei_proj                     # [B, C, Dm]

    fused = jnp.concatenate([text_match, image_match], axis=-1)
    h = jnp.maximum(fused @ params["w1"] + params["b1"], 0.0)
    logits = (h @ params["w2"])[..., 0] + params["b2"][0]           # [B, C]

    mask = entity_mask.astype(jnp.float32)
    neg = jnp.where(mask > 0.0, logits, -1e30)
    mx = neg.max(-1, keepdims=True)
    ex = jnp.exp(neg - mx) * mask
    return ex / jnp.maximum(ex.sum(-1, keepdims=True), 1e-30)


if __name__ == "__main__":
    # Small, module-consistent shapes.
    B, C, L = 2, 8, 8               # batch, candidate entities, text tokens
    Dt, Di = 512, 768               # text_embed_dim, image_embed_dim (fixed in module)
    Dm, H = 128, 128                # model_embed_dim, fuser hidden

    key = jax.random.PRNGKey(0)
    ks = jax.random.split(key, 12)

    mention_text_embed = jax.random.normal(ks[0], (B, L, Dt), jnp.float32)
    entity_text_embeds = jax.random.normal(ks[1], (B, C, L, Dt), jnp.float32)
    mention_image_embed = jax.random.normal(ks[2], (B, Di), jnp.float32)
    entity_image_embeds = jax.random.normal(ks[3], (B, C, Di), jnp.float32)

    mention_text_mask = jnp.ones((B, L), jnp.float32).at[:, L - 2:].set(0.0)
    entity_text_mask = jnp.ones((B, C, L), jnp.float32).at[:, :, L - 3:].set(0.0)
    entity_mask = jnp.ones((B, C), jnp.float32).at[1, C - 2:].set(0.0)  # pad some candidates

    params = {
        "wt": 0.02 * jax.random.normal(ks[4], (Dt, Dm), jnp.float32),
        "bt": 0.02 * jax.random.normal(ks[5], (Dm,), jnp.float32),
        "wi": 0.02 * jax.random.normal(ks[6], (Di, Dm), jnp.float32),
        "bi": 0.02 * jax.random.normal(ks[7], (Dm,), jnp.float32),
        "w1": 0.02 * jax.random.normal(ks[8], (2 * Dm, H), jnp.float32),
        "b1": 0.02 * jax.random.normal(ks[9], (H,), jnp.float32),
        "w2": 0.02 * jax.random.normal(ks[10], (H, 1), jnp.float32),
        "b2": 0.02 * jax.random.normal(ks[11], (1,), jnp.float32),
    }

    # ---- strict f32 parity check (multi-step, pipelined grid) ----
    probs = amelimatch_forward(mention_text_embed, mention_text_mask,
                               entity_text_embeds, entity_text_mask,
                               mention_image_embed, entity_image_embeds,
                               entity_mask, params)
    jax.block_until_ready(probs)

    ref = amelimatch_reference(mention_text_embed, mention_text_mask,
                               entity_text_embeds, entity_text_mask,
                               mention_image_embed, entity_image_embeds,
                               entity_mask, params)
    assert probs.shape == (B, C)
    # Tolerance allows for Mosaic-vs-XLA f32 matmul pass-count differences.
    assert jnp.allclose(probs, ref, rtol=2e-3, atol=2e-4), "f32 kernel mismatch vs reference"

    # ---- bf16 streaming path (the v6e/v7x bandwidth optimization) ----
    bf16 = jnp.bfloat16
    params_bf16 = {k: v.astype(bf16) for k, v in params.items()}
    probs_bf16 = amelimatch_forward(
        mention_text_embed.astype(bf16), mention_text_mask,
        entity_text_embeds.astype(bf16), entity_text_mask,
        mention_image_embed.astype(bf16), entity_image_embeds.astype(bf16),
        entity_mask, params_bf16)
    jax.block_until_ready(probs_bf16)
    assert bool(jnp.all(jnp.isfinite(probs_bf16)))
    assert float(jnp.max(jnp.abs(probs_bf16.astype(jnp.float32) - ref))) < 5e-2, \
        "bf16 kernel diverged from f32 reference"

    print("KERNEL_OK")
</pallas_src>

<mosaic_0001>
module attributes {stable_mosaic.version = 11 : i64} {
  func.func @amelimatch_kernel(%arg0: i32, %arg1: memref<1x8x512xf32, #tpu.memory_space<vmem>>, %arg2: memref<1x1x8xf32, #tpu.memory_space<vmem>>, %arg3: memref<1x8x8x512xf32, #tpu.memory_space<vmem>>, %arg4: memref<1x8x8xf32, #tpu.memory_space<vmem>>, %arg5: memref<1x1x768xf32, #tpu.memory_space<vmem>>, %arg6: memref<1x8x768xf32, #tpu.memory_space<vmem>>, %arg7: memref<1x1x8xf32, #tpu.memory_space<vmem>>, %arg8: memref<512x128xf32, #tpu.memory_space<vmem>>, %arg9: memref<1x128xf32, #tpu.memory_space<vmem>>, %arg10: memref<768x128xf32, #tpu.memory_space<vmem>>, %arg11: memref<1x128xf32, #tpu.memory_space<vmem>>, %arg12: memref<128x128xf32, #tpu.memory_space<vmem>>, %arg13: memref<128x128xf32, #tpu.memory_space<vmem>>, %arg14: memref<1x128xf32, #tpu.memory_space<vmem>>, %arg15: memref<1x128xf32, #tpu.memory_space<vmem>>, %arg16: memref<1xf32, #tpu.memory_space<smem>>, %arg17: memref<1x1x8xf32, #tpu.memory_space<vmem>>) attributes {dimension_semantics = [#tpu.dimension_semantics<parallel>], iteration_bounds = array<i64: 2>, scalar_prefetch = 0 : i64, scratch_operands = 0 : i64, tpu.core_type = #tpu.core_type<tc>, window_params = [{transform_indices = @transform_0, window_bounds = array<i64: 1, 8, 512>}, {transform_indices = @transform_1, window_bounds = array<i64: 1, 1, 8>}, {transform_indices = @transform_2, window_bounds = array<i64: 1, 8, 8, 512>}, {transform_indices = @transform_3, window_bounds = array<i64: 1, 8, 8>}, {transform_indices = @transform_4, window_bounds = array<i64: 1, 1, 768>}, {transform_indices = @transform_5, window_bounds = array<i64: 1, 8, 768>}, {transform_indices = @transform_6, window_bounds = array<i64: 1, 1, 8>}, {pipeline_mode = #tpu.pipeline_mode<synchronous>, transform_indices = @transform_7, window_bounds = array<i64: 512, 128>}, {pipeline_mode = #tpu.pipeline_mode<synchronous>, transform_indices = @transform_8, window_bounds = array<i64: 1, 128>}, {pipeline_mode = #tpu.pipeline_mode<synchronous>, transform_indices = @transform_9, window_bounds = array<i64: 768, 128>}, {pipeline_mode = #tpu.pipeline_mode<synchronous>, transform_indices = @transform_10, window_bounds = array<i64: 1, 128>}, {pipeline_mode = #tpu.pipeline_mode<synchronous>, transform_indices = @transform_11, window_bounds = array<i64: 128, 128>}, {pipeline_mode = #tpu.pipeline_mode<synchronous>, transform_indices = @transform_12, window_bounds = array<i64: 128, 128>}, {pipeline_mode = #tpu.pipeline_mode<synchronous>, transform_indices = @transform_13, window_bounds = array<i64: 1, 128>}, {pipeline_mode = #tpu.pipeline_mode<synchronous>, transform_indices = @transform_14, window_bounds = array<i64: 1, 128>}, {transform_indices = @transform_15, window_bounds = array<i64: 1>}, {transform_indices = @transform_16, window_bounds = array<i64: 1, 1, 8>}]} {
    %c0 = arith.constant 0 : index
    %c0_0 = arith.constant 0 : index
    %c0_1 = arith.constant 0 : index
    %0 = vector.load %arg1[%c0, %c0_0, %c0_1] : memref<1x8x512xf32, #tpu.memory_space<vmem>>, vector<1x8x512xf32>
    %c0_2 = arith.constant 0 : index
    %c0_3 = arith.constant 0 : index
    %c0_4 = arith.constant 0 : index
    %c0_5 = arith.constant 0 : index
    %1 = vector.load %arg3[%c0_2, %c0_3, %c0_4, %c0_5] : memref<1x8x8x512xf32, #tpu.memory_space<vmem>>, vector<1x8x8x512xf32>
    %c0_6 = arith.constant 0 : index
    %c0_7 = arith.constant 0 : index
    %c0_8 = arith.constant 0 : index
    %2 = vector.load %arg5[%c0_6, %c0_7, %c0_8] : memref<1x1x768xf32, #tpu.memory_space<vmem>>, vector<1x1x768xf32>
    %3 = vector.shape_cast %2 : vector<1x1x768xf32> to vector<1x768xf32>
    %c0_9 = arith.constant 0 : index
    %c0_10 = arith.constant 0 : index
    %c0_11 = arith.constant 0 : index
    %4 = vector.load %arg6[%c0_9, %c0_10, %c0_11] : memref<1x8x768xf32, #tpu.memory_space<vmem>>, vector<1x8x768xf32>
    %5 = vector.shape_cast %4 : vector<1x8x768xf32> to vector<8x768xf32>
    %c0_12 = arith.constant 0 : index
    %c0_13 = arith.constant 0 : index
    %c0_14 = arith.constant 0 : index
    %6 = vector.load %arg2[%c0_12, %c0_13, %c0_14] : memref<1x1x8xf32, #tpu.memory_space<vmem>>, vector<1x1x8xf32>
    %c0_15 = arith.constant 0 : index
    %c0_16 = arith.constant 0 : index
    %c0_17 = arith.constant 0 : index
    %7 = vector.load %arg4[%c0_15, %c0_16, %c0_17] : memref<1x8x8xf32, #tpu.memory_space<vmem>>, vector<1x8x8xf32>
    %c0_18 = arith.constant 0 : index
    %c0_19 = arith.constant 0 : index
    %c0_20 = arith.constant 0 : index
    %8 = vector.load %arg7[%c0_18, %c0_19, %c0_20] : memref<1x1x8xf32, #tpu.memory_space<vmem>>, vector<1x1x8xf32>
    %9 = vector.shape_cast %8 : vector<1x1x8xf32> to vector<1x8xf32>
    %10 = vector.shape_cast %6 : vector<1x1x8xf32> to vector<1x8x1xf32>
    %11 = vector.broadcast %10 : vector<1x8x1xf32> to vector<1x8x512xf32>
    %12 = arith.mulf %0, %11 : vector<1x8x512xf32>
    %cst = arith.constant dense<0.000000e+00> : vector<1x512xf32>
    %13 = vector.multi_reduction <add>, %12, %cst [1] : vector<1x8x512xf32> to vector<1x512xf32>
    %14 = vector.shape_cast %7 : vector<1x8x8xf32> to vector<1x8x8x1xf32>
    %15 = vector.broadcast %14 : vector<1x8x8x1xf32> to vector<1x8x8x512xf32>
    %16 = arith.mulf %1, %15 : vector<1x8x8x512xf32>
    %cst_21 = arith.constant dense<0.000000e+00> : vector<1x8x512xf32>
    %17 = vector.multi_reduction <add>, %16, %cst_21 [2] : vector<1x8x8x512xf32> to vector<1x8x512xf32>
    %cst_22 = arith.constant dense<0.000000e+00> : vector<1x1xf32>
    %18 = vector.multi_reduction <add>, %6, %cst_22 [2] : vector<1x1x8xf32> to vector<1x1xf32>
    %cst_23 = arith.constant 1.000000e+00 : f32
    %19 = vector.broadcast %cst_23 : f32 to vector<1x1xf32>
    %20 = arith.maximumf %18, %19 : vector<1x1xf32>
    %cst_24 = arith.constant 1.000000e+00 : f32
    %21 = vector.broadcast %cst_24 : f32 to vector<1x1xf32>
    %22 = arith.divf %21, %20 : vector<1x1xf32>
    %cst_25 = arith.constant dense<0.000000e+00> : vector<1x8xf32>
    %23 = vector.multi_reduction <add>, %7, %cst_25 [2] : vector<1x8x8xf32> to vector<1x8xf32>
    %cst_26 = arith.constant 1.000000e+00 : f32
    %24 = vector.broadcast %cst_26 : f32 to vector<1x8xf32>
    %25 = arith.maximumf %23, %24 : vector<1x8xf32>
    %cst_27 = arith.constant 1.000000e+00 : f32
    %26 = vector.broadcast %cst_27 : f32 to vector<1x8xf32>
    %27 = arith.divf %26, %25 : vector<1x8xf32>
    %28 = vector.shape_cast %17 : vector<1x8x512xf32> to vector<8x512xf32>
    %29 = tpu.concatenate %28, %13 in 0 : vector<8x512xf32>, vector<1x512xf32> -> vector<9x512xf32>
    %c0_28 = arith.constant 0 : index
    %c0_29 = arith.constant 0 : index
    %30 = vector.load %arg8[%c0_28, %c0_29] : memref<512x128xf32, #tpu.memory_space<vmem>>, vector<512x128xf32>
    %cst_30 = arith.constant dense<0.000000e+00> : vector<9x128xf32>
    %31 = tpu.matmul %29, %30, %cst_30 {dimension_numbers = #tpu.dot_dimension_numbers<[1], [0], [0], [1], [0, 0, 1, 1], [], []>} : vector<9x512xf32>, vector<512x128xf32>, vector<9x128xf32> -> vector<9x128xf32>
    %32 = vector.extract_strided_slice %31 {offsets = [0, 0], sizes = [8, 128], strides = [1, 1]} : vector<9x128xf32> to vector<8x128xf32>
    %33 = vector.shape_cast %32 : vector<8x128xf32> to vector<1x8x128xf32>
    %34 = vector.shape_cast %27 : vector<1x8xf32> to vector<1x8x1xf32>
    %35 = vector.broadcast %34 : vector<1x8x1xf32> to vector<1x8x128xf32>
    %36 = arith.mulf %33, %35 : vector<1x8x128xf32>
    %c0_31 = arith.constant 0 : index
    %c0_32 = arith.constant 0 : index
    %37 = vector.load %arg9[%c0_31, %c0_32] : memref<1x128xf32, #tpu.memory_space<vmem>>, vector<1x128xf32>
    %38 = vector.shape_cast %37 : vector<1x128xf32> to vector<1x1x128xf32>
    %39 = vector.broadcast %38 : vector<1x1x128xf32> to vector<1x8x128xf32>
    %40 = arith.addf %36, %39 : vector<1x8x128xf32>
    %41 = vector.extract_strided_slice %31 {offsets = [8, 0], sizes = [1, 128], strides = [1, 1]} : vector<9x128xf32> to vector<1x128xf32>
    %42 = vector.broadcast %22 : vector<1x1xf32> to vector<1x128xf32>
    %43 = arith.mulf %41, %42 : vector<1x128xf32>
    %c0_33 = arith.constant 0 : index
    %c0_34 = arith.constant 0 : index
    %44 = vector.load %arg9[%c0_33, %c0_34] : memref<1x128xf32, #tpu.memory_space<vmem>>, vector<1x128xf32>
    %45 = arith.addf %43, %44 : vector<1x128xf32>
    %46 = vector.shape_cast %45 : vector<1x128xf32> to vector<1x1x128xf32>
    %47 = vector.broadcast %46 : vector<1x1x128xf32> to vector<1x8x128xf32>
    %48 = arith.mulf %47, %40 : vector<1x8x128xf32>
    %49 = vector.shape_cast %48 : vector<1x8x128xf32> to vector<8x128xf32>
    %50 = tpu.concatenate %5, %3 in 0 : vector<8x768xf32>, vector<1x768xf32> -> vector<9x768xf32>
    %c0_35 = arith.constant 0 : index
    %c0_36 = arith.constant 0 : index
    %51 = vector.load %arg10[%c0_35, %c0_36] : memref<768x128xf32, #tpu.memory_space<vmem>>, vector<768x128xf32>
    %cst_37 = arith.constant dense<0.000000e+00> : vector<9x128xf32>
    %52 = tpu.matmul %50, %51, %cst_37 {dimension_numbers = #tpu.dot_dimension_numbers<[1], [0], [0], [1], [0, 0, 1, 1], [], []>} : vector<9x768xf32>, vector<768x128xf32>, vector<9x128xf32> -> vector<9x128xf32>
    %c0_38 = arith.constant 0 : index
    %c0_39 = arith.constant 0 : index
    %53 = vector.load %arg11[%c0_38, %c0_39] : memref<1x128xf32, #tpu.memory_space<vmem>>, vector<1x128xf32>
    %54 = vector.broadcast %53 : vector<1x128xf32> to vector<9x128xf32>
    %55 = arith.addf %52, %54 : vector<9x128xf32>
    %56 = vector.extract_strided_slice %55 {offsets = [0, 0], sizes = [8, 128], strides = [1, 1]} : vector<9x128xf32> to vector<8x128xf32>
    %57 = vector.shape_cast %56 : vector<8x128xf32> to vector<1x8x128xf32>
    %58 = vector.extract_strided_slice %55 {offsets = [8, 0], sizes = [1, 128], strides = [1, 1]} : vector<9x128xf32> to vector<1x128xf32>
    %59 = vector.shape_cast %58 : vector<1x128xf32> to vector<1x1x128xf32>
    %60 = vector.broadcast %59 : vector<1x1x128xf32> to vector<1x8x128xf32>
    %61 = arith.mulf %60, %57 : vector<1x8x128xf32>
    %62 = vector.shape_cast %61 : vector<1x8x128xf32> to vector<8x128xf32>
    %c0_40 = arith.constant 0 : index
    %c0_41 = arith.constant 0 : index
    %63 = vector.load %arg12[%c0_40, %c0_41] : memref<128x128xf32, #tpu.memory_space<vmem>>, vector<128x128xf32>
    %cst_42 = arith.constant dense<0.000000e+00> : vector<8x128xf32>
    %64 = tpu.matmul %49, %63, %cst_42 {dimension_numbers = #tpu.dot_dimension_numbers<[1], [0], [0], [1], [0, 0, 1, 1], [], []>} : vector<8x128xf32>, vector<128x128xf32>, vector<8x128xf32> -> vector<8x128xf32>
    %c0_43 = arith.constant 0 : index
    %c0_44 = arith.constant 0 : index
    %65 = vector.load %arg13[%c0_43, %c0_44] : memref<128x128xf32, #tpu.memory_space<vmem>>, vector<128x128xf32>
    %cst_45 = arith.constant dense<0.000000e+00> : vector<8x128xf32>
    %66 = tpu.matmul %62, %65, %cst_45 {dimension_numbers = #tpu.dot_dimension_numbers<[1], [0], [0], [1], [0, 0, 1, 1], [], []>} : vector<8x128xf32>, vector<128x128xf32>, vector<8x128xf32> -> vector<8x128xf32>
    %67 = arith.addf %64, %66 : vector<8x128xf32>
    %c0_46 = arith.constant 0 : index
    %c0_47 = arith.constant 0 : index
    %68 = vector.load %arg14[%c0_46, %c0_47] : memref<1x128xf32, #tpu.memory_space<vmem>>, vector<1x128xf32>
    %69 = vector.broadcast %68 : vector<1x128xf32> to vector<8x128xf32>
    %70 = arith.addf %67, %69 : vector<8x128xf32>
    %cst_48 = arith.constant 0.000000e+00 : f32
    %71 = vector.broadcast %cst_48 : f32 to vector<8x128xf32>
    %72 = arith.maximumf %70, %71 : vector<8x128xf32>
    %73 = vector.shape_cast %72 : vector<8x128xf32> to vector<1x8x128xf32>
    %c0_49 = arith.constant 0 : index
    %c0_50 = arith.constant 0 : index
    %74 = vector.load %arg15[%c0_49, %c0_50] : memref<1x128xf32, #tpu.memory_space<vmem>>, vector<1x128xf32>
    %75 = vector.shape_cast %74 : vector<1x128xf32> to vector<1x1x128xf32>
    %76 = vector.broadcast %75 : vector<1x1x128xf32> to vector<1x8x128xf32>
    %77 = arith.mulf %73, %76 : vector<1x8x128xf32>
    %cst_51 = arith.constant dense<0.000000e+00> : vector<1x8xf32>
    %78 = vector.multi_reduction <add>, %77, %cst_51 [2] : vector<1x8x128xf32> to vector<1x8xf32>
    %c0_52 = arith.constant 0 : index
    %79 = memref.load %arg16[%c0_52] : memref<1xf32, #tpu.memory_space<smem>>
    %80 = vector.broadcast %79 : f32 to vector<1x8xf32>
    %81 = arith.addf %78, %80 : vector<1x8xf32>
    %cst_53 = arith.constant 0.000000e+00 : f32
    %82 = vector.broadcast %cst_53 : f32 to vector<1x8xf32>
    %83 = arith.cmpf ogt, %9, %82 : vector<1x8xf32>
    %cst_54 = arith.constant -1.000000e+30 : f32
    %84 = vector.broadcast %cst_54 : f32 to vector<1x8xf32>
    %85 = arith.select %83, %81, %84 : vector<1x8xi1>, vector<1x8xf32>
    %cst_55 = arith.constant dense<0xFF800000> : vector<1xf32>
    %86 = vector.multi_reduction <maximumf>, %85, %cst_55 [1] : vector<1x8xf32> to vector<1xf32>
    %87 = vector.shape_cast %86 : vector<1xf32> to vector<1x1xf32>
    %88 = vector.broadcast %87 : vector<1x1xf32> to vector<1x8xf32>
    %89 = arith.subf %85, %88 : vector<1x8xf32>
    %90 = math.exp %89 : vector<1x8xf32>
    %91 = arith.mulf %90, %9 : vector<1x8xf32>
    %cst_56 = arith.constant dense<0.000000e+00> : vector<1xf32>
    %92 = vector.multi_reduction <add>, %91, %cst_56 [1] : vector<1x8xf32> to vector<1xf32>
    %93 = vector.shape_cast %92 : vector<1xf32> to vector<1x1xf32>
    %cst_57 = arith.constant 1.000000e-30 : f32
    %94 = vector.broadcast %cst_57 : f32 to vector<1x1xf32>
    %95 = arith.maximumf %93, %94 : vector<1x1xf32>
    %96 = vector.broadcast %95 : vector<1x1xf32> to vector<1x8xf32>
    %97 = arith.divf %91, %96 : vector<1x8xf32>
    %98 = vector.shape_cast %97 : vector<1x8xf32> to vector<1x1x8xf32>
    %c0_58 = arith.constant 0 : index
    %c0_59 = arith.constant 0 : index
    %c0_60 = arith.constant 0 : index
    %99 = vector.load %arg17[%c0_58, %c0_59, %c0_60] : memref<1x1x8xf32, #tpu.memory_space<vmem>>, vector<1x1x8xf32>
    tpu.vector_store %arg17[%c0_58, %c0_59, %c0_60], %98 {strides = array<i32>} : memref<1x1x8xf32, #tpu.memory_space<vmem>>, vector<1x1x8xf32>,
    return
  }
  func.func @transform_0(%arg0: i32) -> (i32, i32, i32) {
    %c0_i32 = arith.constant 0 : i32
    %c0_i32_0 = arith.constant 0 : i32
    %c0_i32_1 = arith.constant 0 : i32
    return %arg0, %c0_i32, %c0_i32_0 : i32, i32, i32
  }
  func.func @transform_1(%arg0: i32) -> (i32, i32, i32) {
    %c0_i32 = arith.constant 0 : i32
    %c0_i32_0 = arith.constant 0 : i32
    %c0_i32_1 = arith.constant 0 : i32
    return %arg0, %c0_i32, %c0_i32_0 : i32, i32, i32
  }
  func.func @transform_2(%arg0: i32) -> (i32, i32, i32, i32) {
    %c0_i32 = arith.constant 0 : i32
    %c0_i32_0 = arith.constant 0 : i32
    %c0_i32_1 = arith.constant 0 : i32
    %c0_i32_2 = arith.constant 0 : i32
    return %arg0, %c0_i32, %c0_i32_0, %c0_i32_1 : i32, i32, i32, i32
  }
  func.func @transform_3(%arg0: i32) -> (i32, i32, i32) {
    %c0_i32 = arith.constant 0 : i32
    %c0_i32_0 = arith.constant 0 : i32
    %c0_i32_1 = arith.constant 0 : i32
    return %arg0, %c0_i32, %c0_i32_0 : i32, i32, i32
  }
  func.func @transform_4(%arg0: i32) -> (i32, i32, i32) {
    %c0_i32 = arith.constant 0 : i32
    %c0_i32_0 = arith.constant 0 : i32
    %c0_i32_1 = arith.constant 0 : i32
    return %arg0, %c0_i32, %c0_i32_0 : i32, i32, i32
  }
  func.func @transform_5(%arg0: i32) -> (i32, i32, i32) {
    %c0_i32 = arith.constant 0 : i32
    %c0_i32_0 = arith.constant 0 : i32
    %c0_i32_1 = arith.constant 0 : i32
    return %arg0, %c0_i32, %c0_i32_0 : i32, i32, i32
  }
  func.func @transform_6(%arg0: i32) -> (i32, i32, i32) {
    %c0_i32 = arith.constant 0 : i32
    %c0_i32_0 = arith.constant 0 : i32
    %c0_i32_1 = arith.constant 0 : i32
    return %arg0, %c0_i32, %c0_i32_0 : i32, i32, i32
  }
  func.func @transform_7(%arg0: i32) -> (i32, i32) {
    %c0_i32 = arith.constant 0 : i32
    %c0_i32_0 = arith.constant 0 : i32
    %c0_i32_1 = arith.constant 0 : i32
    return %c0_i32, %c0_i32_0 : i32, i32
  }
  func.func @transform_8(%arg0: i32) -> (i32, i32) {
    %c0_i32 = arith.constant 0 : i32
    %c0_i32_0 = arith.constant 0 : i32
    %c0_i32_1 = arith.constant 0 : i32
    return %c0_i32, %c0_i32_0 : i32, i32
  }
  func.func @transform_9(%arg0: i32) -> (i32, i32) {
    %c0_i32 = arith.constant 0 : i32
    %c0_i32_0 = arith.constant 0 : i32
    %c0_i32_1 = arith.constant 0 : i32
    return %c0_i32, %c0_i32_0 : i32, i32
  }
  func.func @transform_10(%arg0: i32) -> (i32, i32) {
    %c0_i32 = arith.constant 0 : i32
    %c0_i32_0 = arith.constant 0 : i32
    %c0_i32_1 = arith.constant 0 : i32
    return %c0_i32, %c0_i32_0 : i32, i32
  }
  func.func @transform_11(%arg0: i32) -> (i32, i32) {
    %c0_i32 = arith.constant 0 : i32
    %c0_i32_0 = arith.constant 0 : i32
    %c0_i32_1 = arith.constant 0 : i32
    return %c0_i32, %c0_i32_0 : i32, i32
  }
  func.func @transform_12(%arg0: i32) -> (i32, i32) {
    %c0_i32 = arith.constant 0 : i32
    %c0_i32_0 = arith.constant 0 : i32
    %c0_i32_1 = arith.constant 0 : i32
    return %c0_i32, %c0_i32_0 : i32, i32
  }
  func.func @transform_13(%arg0: i32) -> (i32, i32) {
    %c0_i32 = arith.constant 0 : i32
    %c0_i32_0 = arith.constant 0 : i32
    %c0_i32_1 = arith.constant 0 : i32
    return %c0_i32, %c0_i32_0 : i32, i32
  }
  func.func @transform_14(%arg0: i32) -> (i32, i32) {
    %c0_i32 = arith.constant 0 : i32
    %c0_i32_0 = arith.constant 0 : i32
    %c0_i32_1 = arith.constant 0 : i32
    return %c0_i32, %c0_i32_0 : i32, i32
  }
  func.func @transform_15(%arg0: i32) -> i32 {
    %c0_i32 = arith.constant 0 : i32
    %c0_i32_0 = arith.constant 0 : i32
    return %c0_i32 : i32
  }
  func.func @transform_16(%arg0: i32) -> (i32, i32, i32) {
    %c0_i32 = arith.constant 0 : i32
    %c0_i32_0 = arith.constant 0 : i32
    %c0_i32_1 = arith.constant 0 : i32
    return %arg0, %c0_i32, %c0_i32_0 : i32, i32, i32
  }
}

</mosaic_0001>

<bundles_post_ra>
// kernel: tpu_custom_call.1
= control target key start
LH: loop header
LB: loop body
LE: loop exit
PB: predicated region body
PF: predicated region fallthrough
CT: control target
= control target key end

     0   :  { %s3909_s0 = inlined_call_operand.hbm [shape: f32[2,8,512], index: 0, kind: input, shape index: {}]   ;;  %s3910_s1 = inlined_call_operand.vmem [shape: f32[2,1,8], index: 1, kind: input, shape index: {}]   ;;  %s3911_s2 = inlined_call_operand.hbm [shape: f32[2,8,8,512], index: 2, kind: input, shape index: {}]   ;;  %s3912_s3 = inlined_call_operand.hbm [shape: f32[2,8,8], index: 3, kind: input, shape index: {}]   ;;  %s3913_s4 = inlined_call_operand.hbm [shape: f32[2,1,768], index: 4, kind: input, shape index: {}]   ;;  %s3914_s5 = inlined_call_operand.hbm [shape: f32[2,8,768], index: 5, kind: input, shape index: {}]   ;;  %s3915_s6 = inlined_call_operand.vmem [shape: f32[2,1,8], index: 6, kind: input, shape index: {}]   ;;  %s3916_s7 = inlined_call_operand.hbm [shape: f32[512,128], index: 7, kind: input, shape index: {}]   ;;  %s3917_s8 = inlined_call_operand.vmem [shape: f32[1,128], index: 8, kind: input, shape index: {}]   ;;  %s3918_s9 = inlined_call_operand.hbm [shape: f32[768,128], index: 9, kind: input, shape index: {}]   ;;  %s3919_s10 = inlined_call_operand.vmem [shape: f32[1,128], index: 10, kind: input, shape index: {}]   ;;  %s3920_s11 = inlined_call_operand.hbm [shape: f32[128,128], index: 11, kind: input, shape index: {}]   ;;  %s3921_s12 = inlined_call_operand.hbm [shape: f32[128,128], index: 12, kind: input, shape index: {}]   ;;  %s3922_s13 = inlined_call_operand.vmem [shape: f32[1,128], index: 13, kind: input, shape index: {}]   ;;  %s3923_s14 = inlined_call_operand.vmem [shape: f32[1,128], index: 14, kind: input, shape index: {}]   ;;  %s3924_s15 = inlined_call_operand.<no memory space> [shape: f32[1], index: 15, kind: input, shape index: {}]   ;;  %s3925_s16 = inlined_call_operand.hbm [shape: f32[2,1,8], index: 16, kind: output, shape index: {}]  }
   0x1   :  { %3951 = sst [smem:[#allocation31_spill]] %s3909_s0 }
   0x2   :  { %3952 = sst [smem:[#allocation32_spill]] %s3911_s2 }
   0x3   :  { %3953 = sst [smem:[#allocation33_spill]] %s3913_s4 }
   0x4   :  { %3954 = sst [smem:[#allocation34_spill]] %s3915_s6 }
   0x5   :  { %3955 = sst [smem:[#allocation35_spill]] %s3916_s7 }
   0x6   :  { %3956 = sst [smem:[#allocation36_spill]] %s3917_s8 }
   0x7   :  { %3957 = sst [smem:[#allocation37_spill]] %s3918_s9 }
   0x8   :  { %3958 = sst [smem:[#allocation38_spill]] %s3919_s10 }
   0x9   :  { %3959 = sst [smem:[#allocation39_spill]] %s3920_s11 }
   0xa   :  { %3960 = sst [smem:[#allocation40_spill]] %s3922_s13 }
   0xb   :  { %3961 = sst [smem:[#allocation41_spill]] %s3923_s14 }
   0xc   :  { %3962 = sst [smem:[#allocation42_spill]] %s3925_s16 }
   0xd   :  { %21 = sst [smem:[#allocation2]] %s3924_s15 }
   0xe   :  { %22 = vsyncpa [#allocation4], 0 }
   0xf   :  { %24 = vsyncpa [#allocation4 + $0x1], 0 }
  0x10   :  { %25 = vsyncpa [#allocation7], 0 }
  0x11   :  { %27 = vsyncpa [#allocation7 + $0x1], 0 }
  0x12   :  { %28 = vsyncpa [#allocation10], 0 }
  0x13   :  { %30 = vsyncpa [#allocation10 + $0x1], 0 }
  0x14   :  { %31 = vsyncpa [#allocation13], 0 }
  0x15   :  { %32 = vsyncpa [#allocation16], 0 }
  0x16   :  { %33 = vsyncpa [#allocation5], 0 }
  0x17   :  { %35 = vsyncpa [#allocation5 + $0x1], 0  ;;  %s3238_s23 = smov 0   ;;  %s3240_s24 = smov 0  }
  0x18   :  { %s3242_s25 = smov 0   ;;  %s3244_s26 = smov 0  }
  0x19 LB: > { %3963 = sst [smem:[#allocation25_spill]] %s3118_s23  ;;  %s3259_s15 = sadd.s32 4294967295, %s3130_s26   ;;  %s3130_s26 = sphi %s3244_s26, %s4014_s26   ;;  %s3126_s25 = sphi %s3242_s25, %s4016_s25   ;;  %s3122_s24 = sphi %s3240_s24, %s4018_s24   ;;  %s3118_s23 = sphi %s3238_s23, %s4017_s23  }
  0x1a   : > { %3964 = sst [smem:[#allocation26_spill]] %s3126_s25  ;;  %s2348_s27 = sadd.s32 4294967294, %s3130_s26  }
  0x1b   : > { %s3263_s28 = sadd.s32 1, %s3130_s26   ;;  %s48_s29 = sadd.s32 1, %s3126_s25 }
  0x1c   : > { %3965 = sst [smem:[#allocation27_spill]] %s3263_s28  ;;  %s45_s30 = ssub.s32 %s3130_s26, %s3263_s28 }
  0x1d   : > { %p3927_p0 = scmp.ne.s32.totalorder %s3126_s25, %s3122_s24  ;;  %p46_p1 = scmp.eq.s32.totalorder %s45_s30, 0 }
  0x1e   : > { %p61_p2 = scmp.ne.s32.totalorder %s3122_s24, %s3118_s23  ;;  %p3928_p3 = scmp.eq.s32.totalorder %s3259_s15, 0 }
  0x1f   : > { %p430_p4 = scmp.eq.s32.totalorder %s3259_s15, 1  ;;  %p436_p7 = scmp.eq.s32.totalorder %s2348_s27, 1 }
  0x20   : > { %s3275_s0 = scalar_select %p46_p1, %s3126_s25, %s48_s29  }
  0x21   : > { %p3279_p5 = por %p3928_p3, %p61_p2  ;;  %p3286_p6 = por %p430_p4, %p3927_p0 }
  0x22   : > { %3966 = sst [smem:[#allocation28_spill]] %s3275_s0  ;;  %p2349_p8 = scmp.ge.s32.totalorder %s3130_s26, 1 }
  0x23   : > { %s3967_s17 = scalar_select %p3279_p5, 1, 0 }
  0x24   : > { %s3968_s18 = scalar_select %p3286_p6, 1, 0 }
  0x25   : > { %p443_p9 = scmp.lt.s32.totalorder %s3130_s26, 3  ;;  %p3292_p10 = por %p436_p7, %p61_p2 }
  0x26   : > { %3969 = sst [smem:[#allocation29_spill]] %s3968_s18  ;;  %s3132_s21 = smov [#allocation12]  }
  0x27   : > { %s3970_s19 = scalar_select %p3292_p10, 1, 0 }
  0x28   : > { %p3296_p11 = pnand %p2349_p8, %p443_p9  ;;  %s455_s22 = sshll.u32 %s3132_s21, 4  ;;  %s456_s22 = int_to_ptr.vmem [resolvable:$true] %s455_s22 }
  0x29   : > { %3971 = sst [smem:[#allocation30_spill]] %s3970_s19  ;;  %s3133_s29 = smov [#allocation15]  }
  0x2a   : > { %s3972_s20 = scalar_select %p3296_p11, 1, 0 }
  0x2b   : > { %p2709_p12 = pneg %p3296_p11  ;;  %s487_s30 = sshll.u32 %s3133_s29, 4  ;;  %s488_s30 = int_to_ptr.vmem [resolvable:$true] %s487_s30 }
  0x2c   : > { %p56_p2 = scmp.eq.s32.totalorder %s3130_s26, 0  ;;  %p2746_p4 = scmp.lt.s32.totalorder %s3130_s26, 2 }
  0x2d   : > { %p3305_p1 = pnand %p2709_p12, %p3928_p3  ;;  %s2817_s0 = scalar_lea.vmem %s456_s22, 8192 }
  0x2e   : > { %p2818_p8 = scmp.ne.s32.totalorder %s456_s22, %s2817_s0  ;;  %p2825_p0 = scmp.lt.s32.totalorder %s456_s22, %s456_s22 }
  0x2f   : > { %s3973_s27 = scalar_select %p3305_p1, 1, 0 }
  0x30   : > { %p3942_p7 = pneg %p3305_p1  ;;  %p2826_p12 = scmp.lt.s32.totalorder %s2817_s0, %s2817_s0 }
  0x32   : > { %p2820_p9 = pnand %p2818_p8, %p3942_p7  ;;  %p2827_p3 = por %p2826_p12, %p2825_p0 }
  0x34   : > { %p2821_p13 = pneg %p2820_p9 }
  0x36   : > { %p2828_p10 = pnand %p2827_p3, %p2821_p13 }
  0x38   : > { %2831 = shalt.err (!%p2828_p10)
}
  0x39   : > { %s3936_s21 = smov 128   ;;  %s3938_s29 = smov 8  }
  0x3a   : > { %s3974_s7 = sld [smem:[#allocation35_spill]]  ;;  %s2843_s23 = scalar_lea.vmem %s488_s30, 2048 }
  0x3b   : > { %p2844_p8 = scmp.ne.s32.totalorder %s488_s30, %s2843_s23  ;;  %p2851_p3 = scmp.lt.s32.totalorder %s488_s30, %s488_s30 }
  0x3c   : > { %p2852_p10 = scmp.lt.s32.totalorder %s2843_s23, %s2843_s23 }
  0x3d   : > { %p2846_p9 = pnand %p2844_p8, %p3942_p7 }
  0x3e   : > { %p2853_p13 = por %p2852_p10, %p2851_p3 }
  0x3f   : > { %p2847_p0 = pneg %p2846_p9 }
  0x40   : > { %2712 = dma.hbm_to_vmem [thread:$0]  (!%p3305_p1), %s3974_s7, 8192, %s456_s22, [#allocation13], %s3936_s21, %s3936_s21, %s3938_s29  }
  0x41   : > { %p2854_p12 = pnand %p2853_p13, %p2847_p0 }
  0x43   : > { %2857 = shalt.err (!%p2854_p12)
}
  0x44   : > { %s3975_s11 = sld [smem:[#allocation39_spill]]  ;;  %p3976_p8 = scmp.ne.s32.totalorder %s3126_s25, %s3122_s24 }
  0x45   : > { %s3341_s23 = sand.u32 1, %s3126_s25   ;;  %s3941_s28 = sand.u32 1, %s3130_s26  }
  0x46   : > { %p57_p9 = por %p56_p2, %p3976_p8  ;;  %s2358_s19 = sshll.u32 %s3341_s23, 8 }
  0x47   : > { %s2380_s22 = sshll.u32 %s3130_s26, 12  ;;  %s3978_s2 = sld [smem:[#allocation32_spill]] }
  0x48   : > { %p3347_p0 = pnand %p2746_p4, %p57_p9 }
  0x4a   : > { %2718 = dma.hbm_to_vmem [thread:$0]  (!%p3305_p1), %s3975_s11, 2048, %s488_s30, [#allocation16], %s3936_s21, %s3936_s21, %s3938_s29  }
  0x4b   : > { %s552_s30 = scalar_lea.vmem [#allocation6], %s2358_s19  ;;  %s3361_s29 = scalar_lea.sflag [#allocation7], %s3941_s28 }
  0x4c   : > { %s559_s21 = sshll.u32 %s552_s30, 4  ;;  %p3367_p4 = pneg %p3347_p0  ;;  %s3357_s21 = int_to_ptr.vmem [resolvable:$true] %s559_s21 }
  0x4d   : > { %s3355_s18 = scalar_lea.hbm %s3978_s2, %s2380_s22  ;;  %s2863_s19 = scalar_lea.hbm %s3978_s2, 8192 }
  0x4e   : > { %s2858_s11 = scalar_lea.hbm %s3355_s18, 4096  ;;  %p2864_p13 = scmp.lt.s32.totalorder %s3355_s18, %s3978_s2 }
  0x4f   : > { %p2859_p2 = scmp.ne.s32.totalorder %s3355_s18, %s2858_s11  ;;  %p2865_p12 = scmp.lt.s32.totalorder %s2863_s19, %s2858_s11 }
  0x51   : > { %p2861_p3 = pnand %p3367_p4, %p2859_p2  ;;  %p2866_p8 = por %p2865_p12, %p2864_p13 }
  0x53   : > { %p2862_p10 = pneg %p2861_p3 }
  0x55   : > { %p2867_p9 = pnand %p2866_p8, %p2862_p10 }
  0x57   : > { %2870 = shalt.err (!%p2867_p9)
}
  0x58   : > { %s2871_s28 = scalar_lea.vmem %s3357_s21, 4096  ;;  %s3136_s6 = smov [#allocation6]  }
  0x59   : > { %p2872_p7 = scmp.ne.s32.totalorder %s3357_s21, %s2871_s28  ;;  %s2876_s7 = sshll.u32 %s3136_s6, 4  ;;  %s2877_s7 = int_to_ptr.vmem [resolvable:$false] %s2876_s7 }
  0x5a   : > { %s2878_s22 = scalar_lea.vmem %s2877_s7, 8192  ;;  %p2879_p6 = scmp.lt.s32.totalorder %s3357_s21, %s2877_s7 }
  0x5b   : > { %p2874_p2 = pnand %p2872_p7, %p3367_p4  ;;  %p2880_p5 = scmp.lt.s32.totalorder %s2878_s22, %s2871_s28 }
  0x5d   : > { %p2875_p3 = pneg %p2874_p2  ;;  %p2881_p11 = por %p2880_p5, %p2879_p6 }
  0x5f   : > { %p2882_p1 = pnand %p2881_p11, %p2875_p3 }
  0x61   : > { %2885 = shalt.err (!%p2882_p1)
}
  0x62   : > { %s3137_s11 = smov 512   ;;  %s3138_s19 = smov 32  }
  0x63   : > { %2728 = dma.hbm_to_vmem [thread:$0]  (!%p3347_p0), %s3355_s18, 4096, %s3357_s21, %s3361_s29, %s3137_s11, %s3137_s11, %s3138_s19  }
  0x64   : > { %s2675_s6 = smul.u32 6, %s3341_s23  ;;  %s3139_s30 = smov [#allocation14]  }
  0x65   : > { %s2676_s0 = smul.u32 96, %s3130_s26  ;;  %s471_s7 = sshll.u32 %s3139_s30, 4  ;;  %s3397_s7 = int_to_ptr.vmem [resolvable:$true] %s471_s7 }
  0x66   : > { %s3980_s4 = sld [smem:[#allocation33_spill]]  ;;  %s591_s14 = scalar_lea.vmem [#allocation9], %s2675_s6 }
  0x67   : > { %s599_s13 = sshll.u32 %s591_s14, 4  ;;  %s3981_s10 = sand.u32 1, %s3130_s26   ;;  %s600_s13 = int_to_ptr.vmem [resolvable:$true] %s599_s13 }
  0x68   : > { %s3401_s8 = scalar_lea.sflag [#allocation10], %s3981_s10 }
  0x6c   : > { %s3395_s2 = scalar_lea.hbm %s3980_s4, %s2676_s0  ;;  %s2891_s19 = scalar_lea.hbm %s3980_s4, 192 }
  0x6d   : > { %s2886_s18 = scalar_lea.hbm %s3395_s2, 96  ;;  %p2892_p1 = scmp.lt.s32.totalorder %s3395_s2, %s3980_s4 }
  0x6e   : > { %p2887_p5 = scmp.ne.s32.totalorder %s3395_s2, %s2886_s18  ;;  %p2893_p7 = scmp.lt.s32.totalorder %s2891_s19, %s2886_s18 }
  0x70   : > { %p2889_p6 = pnand %p2887_p5, %p3367_p4  ;;  %p2894_p10 = por %p2893_p7, %p2892_p1 }
  0x72   : > { %p2890_p11 = pneg %p2889_p6 }
  0x74   : > { %p2895_p13 = pnand %p2894_p10, %p2890_p11 }
  0x76   : > { %2898 = shalt.err (!%p2895_p13)
}
  0x77   : > { %s2899_s14 = scalar_lea.vmem %s600_s13, 96  ;;  %s3140_s10 = smov [#allocation9]  }
  0x78   : > { %p2900_p12 = scmp.ne.s32.totalorder %s600_s13, %s2899_s14  ;;  %s2904_s6 = sshll.u32 %s3140_s10, 4  ;;  %s2905_s6 = int_to_ptr.vmem [resolvable:$false] %s2904_s6 }
  0x79   : > { %s2906_s28 = scalar_lea.vmem %s2905_s6, 192  ;;  %p2907_p2 = scmp.lt.s32.totalorder %s600_s13, %s2905_s6 }
  0x7a   : > { %p2902_p8 = pnand %p2900_p12, %p3367_p4  ;;  %p2908_p3 = scmp.lt.s32.totalorder %s2906_s28, %s2899_s14 }
  0x7c   : > { %p2903_p9 = pneg %p2902_p8  ;;  %p2909_p5 = por %p2908_p3, %p2907_p2 }
  0x7e   : > { %p2910_p6 = pnand %p2909_p5, %p2903_p9 }
  0x80   : > { %2913 = shalt.err (!%p2910_p6)
}
  0x81   : > { %2734 = dma.hbm_to_vmem [thread:$0]  (!%p3347_p0), %s3395_s2, 96, %s600_s13, %s3401_s8  }
  0x82   : > { %s2925_s22 = scalar_lea.vmem %s3397_s7, 12288  ;;  %p3982_p1 = scmp.ne.s32.totalorder %s3973_s27, 0 }
  0x83   : > { %p2926_p11 = scmp.ne.s32.totalorder %s3397_s7, %s2925_s22  ;;  %p2933_p12 = scmp.lt.s32.totalorder %s3397_s7, %s3397_s7 }
  0x84   : > { %p3983_p7 = pneg %p3982_p1  ;;  %p2934_p8 = scmp.lt.s32.totalorder %s2925_s22, %s2925_s22 }
  0x86   : > { %p2928_p10 = pnand %p2926_p11, %p3983_p7  ;;  %p2935_p9 = por %p2934_p8, %p2933_p12 }
  0x88   : > { %p2929_p13 = pneg %p2928_p10 }
  0x8a   : > { %p2936_p2 = pnand %p2935_p9, %p2929_p13 }
  0x8c   : > { %2939 = shalt.err (!%p2936_p2)
}
  0x8d   : > { %s3984_s18 = smov 8   ;;  %s3985_s21 = smov 128  }
  0x8e   : > { %s3986_s9 = sld [smem:[#allocation37_spill]]  ;;  %s3141_s13 = smov [#allocation17]  }
  0x8f   : > { %s500_s19 = sshll.u32 %s3141_s13, 4  ;;  %s2355_s0 = sshll.u32 %s3341_s23, 5  ;;  %s501_s19 = int_to_ptr.vmem [resolvable:$true] %s500_s19 }
  0x90   : > { %s2951_s30 = scalar_lea.vmem %s501_s19, 2048  ;;  %p3987_p5 = pmov %p3983_p7 }
  0x91   : > { %p2952_p3 = scmp.ne.s32.totalorder %s501_s19, %s2951_s30  ;;  %p2959_p7 = scmp.lt.s32.totalorder %s501_s19, %s501_s19 }
  0x92   : > { %p2960_p10 = scmp.lt.s32.totalorder %s2951_s30, %s2951_s30 }
  0x93   : > { %p2954_p6 = pnand %p2952_p3, %p3987_p5 }
  0x94   : > { %2715 = dma.hbm_to_vmem [thread:$0]  (!%p3982_p1), %s3986_s9, 12288, %s3397_s7, [#allocation13], %s3985_s21, %s3985_s21, %s3984_s18  }
  0x95   : > { %p2955_p11 = pneg %p2954_p6  ;;  %p2961_p13 = por %p2960_p10, %p2959_p7 }
  0x97   : > { %p2962_p12 = pnand %p2961_p13, %p2955_p11 }
  0x99   : > { %2965 = shalt.err (!%p2962_p12)
}
  0x9a   : > { %2721 = dma.hbm_to_vmem [thread:$0]  (!%p3982_p1), %s3921_s12, 2048, %s501_s19, [#allocation16], %s3985_s21, %s3985_s21, %s3984_s18  }
  0x9b   : > { %s2379_s10 = sshll.u32 %s3130_s26, 9  ;;  %s527_s6 = scalar_lea.vmem [#allocation3], %s2355_s0 }
  0x9c   : > { %s535_s28 = sshll.u32 %s527_s6, 4  ;;  %s3988_s2 = sld [smem:[#allocation31_spill]]  ;;  %s536_s28 = int_to_ptr.vmem [resolvable:$true] %s535_s28 }
  0x9d   : > { %s524_s30 = scalar_lea.sflag [#allocation4], %s3341_s23 }
  0xa2   : > { %s533_s13 = scalar_lea.hbm %s3988_s2, %s2379_s10  ;;  %s2971_s14 = scalar_lea.hbm %s3988_s2, 1024 }
  0xa3   : > { %s2966_s27 = scalar_lea.hbm %s533_s13, 512  ;;  %p2972_p1 = scmp.lt.s32.totalorder %s533_s13, %s3988_s2 }
  0xa4   : > { %p2967_p8 = scmp.ne.s32.totalorder %s533_s13, %s2966_s27  ;;  %p2973_p3 = scmp.lt.s32.totalorder %s2971_s14, %s2966_s27 }
  0xa6   : > { %p2969_p9 = pnand %p2967_p8, %p3367_p4  ;;  %p2974_p5 = por %p2973_p3, %p2972_p1 }
  0xa8   : > { %p2970_p2 = pneg %p2969_p9 }
  0xaa   : > { %p2975_p6 = pnand %p2974_p5, %p2970_p2 }
  0xac   : > { %2978 = shalt.err (!%p2975_p6)
}
  0xad   : > { %s2979_s21 = scalar_lea.vmem %s536_s28, 512  ;;  %s3142_s19 = smov [#allocation3]  }
  0xae   : > { %p2980_p11 = scmp.ne.s32.totalorder %s536_s28, %s2979_s21  ;;  %s2984_s0 = sshll.u32 %s3142_s19, 4  ;;  %s2985_s0 = int_to_ptr.vmem [resolvable:$false] %s2984_s0 }
  0xaf   : > { %s2986_s10 = scalar_lea.vmem %s2985_s0, 1024  ;;  %p2987_p13 = scmp.lt.s32.totalorder %s536_s28, %s2985_s0 }
  0xb0   : > { %p2982_p7 = pnand %p2980_p11, %p3367_p4  ;;  %p2988_p12 = scmp.lt.s32.totalorder %s2986_s10, %s2979_s21 }
  0xb2   : > { %p2983_p10 = pneg %p2982_p7  ;;  %p2989_p8 = por %p2988_p12, %p2987_p13 }
  0xb4   : > { %p2990_p9 = pnand %p2989_p8, %p2983_p10 }
  0xb6   : > { %2993 = shalt.err (!%p2990_p9)
}
  0xb7   : > { %2725 = dma.hbm_to_vmem [thread:$0]  (!%p3347_p0), %s533_s13, 512, %s536_s28, %s524_s30  }
  0xb8   : > { %s2361_s4 = sshll.u32 %s3341_s23, 3  ;;  %s2362_s9 = sshll.u32 %s3130_s26, 7 }
  0xb9   : > { %s3470_s11 = scalar_lea.hbm %s3912_s3, %s2362_s9  ;;  %s573_s27 = scalar_lea.vmem [#allocation8], %s2361_s4 }
  0xba   : > { %s580_s7 = sshll.u32 %s573_s27, 4  ;;  %s2677_s14 = smul.u32 48, %s3341_s23  ;;  %s581_s7 = int_to_ptr.vmem [resolvable:$true] %s580_s7 }
  0xbb   : > { %s2678_s18 = smul.u32 768, %s3130_s26  ;;  %s2994_s21 = scalar_lea.hbm %s3470_s11, 128 }
  0xbc   : > { %p2995_p2 = scmp.ne.s32.totalorder %s3470_s11, %s2994_s21  ;;  %s2999_s30 = scalar_lea.hbm %s3912_s3, 256 }
  0xbd   : > { %p3000_p5 = scmp.lt.s32.totalorder %s3470_s11, %s3912_s3  ;;  %p3001_p6 = scmp.lt.s32.totalorder %s2999_s30, %s2994_s21 }
  0xbe   : > { %p2997_p1 = pnand %p2995_p2, %p3367_p4 }
  0xbf   : > { %p3002_p11 = por %p3001_p6, %p3000_p5 }
  0xc0   : > { %p2998_p3 = pneg %p2997_p1 }
  0xc2   : > { %p3003_p7 = pnand %p3002_p11, %p2998_p3 }
  0xc4   : > { %3006 = shalt.err (!%p3003_p7)
}
  0xc5   : > { %s3007_s23 = scalar_lea.vmem %s581_s7, 128  ;;  %s3143_s10 = smov [#allocation8]  }
  0xc6   : > { %p3008_p10 = scmp.ne.s32.totalorder %s581_s7, %s3007_s23  ;;  %s3012_s4 = sshll.u32 %s3143_s10, 4  ;;  %s3013_s4 = int_to_ptr.vmem [resolvable:$false] %s3012_s4 }
  0xc7   : > { %s3014_s9 = scalar_lea.vmem %s3013_s4, 256  ;;  %p3015_p8 = scmp.lt.s32.totalorder %s581_s7, %s3013_s4 }
  0xc8   : > { %p3010_p13 = pnand %p3008_p10, %p3367_p4  ;;  %p3016_p9 = scmp.lt.s32.totalorder %s3014_s9, %s3007_s23 }
  0xca   : > { %p3011_p12 = pneg %p3010_p13  ;;  %p3017_p2 = por %p3016_p9, %p3015_p8 }
  0xcc   : > { %p3018_p1 = pnand %p3017_p2, %p3011_p12 }
  0xce   : > { %3021 = shalt.err (!%p3018_p1)
}
  0xcf   : > { %2731 = dma.hbm_to_vmem [thread:$0]  (!%p3347_p0), %s3470_s11, 128, %s581_s7, %s3361_s29  }
  0xd0   : > { %s616_s27 = scalar_lea.hbm %s3914_s5, %s2678_s18  ;;  %s610_s21 = scalar_lea.vmem [#allocation11], %s2677_s14 }
  0xd1   : > { %s618_s28 = sshll.u32 %s610_s21, 4  ;;  %s3022_s13 = scalar_lea.hbm %s616_s27, 768  ;;  %s619_s28 = int_to_ptr.vmem [resolvable:$true] %s618_s28 }
  0xd2   : > { %p3023_p3 = scmp.ne.s32.totalorder %s616_s27, %s3022_s13  ;;  %s3027_s0 = scalar_lea.hbm %s3914_s5, 1536 }
  0xd3   : > { %p3028_p11 = scmp.lt.s32.totalorder %s616_s27, %s3914_s5  ;;  %p3029_p7 = scmp.lt.s32.totalorder %s3027_s0, %s3022_s13 }
  0xd4   : > { %p3025_p5 = pnand %p3023_p3, %p3367_p4 }
  0xd5   : > { %p3030_p10 = por %p3029_p7, %p3028_p11 }
  0xd6   : > { %p3026_p6 = pneg %p3025_p5 }
  0xd8   : > { %p3031_p13 = pnand %p3030_p10, %p3026_p6 }
  0xda   : > { %3034 = shalt.err (!%p3031_p13)
}
  0xdb   : > { %s3035_s29 = scalar_lea.vmem %s619_s28, 768  ;;  %s3144_s11 = smov [#allocation11]  }
  0xdc   : > { %p3036_p12 = scmp.ne.s32.totalorder %s619_s28, %s3035_s29  ;;  %s3040_s7 = sshll.u32 %s3144_s11, 4  ;;  %s3041_s7 = int_to_ptr.vmem [resolvable:$false] %s3040_s7 }
  0xdd   : > { %s3042_s14 = scalar_lea.vmem %s3041_s7, 1536  ;;  %p3043_p2 = scmp.lt.s32.totalorder %s619_s28, %s3041_s7 }
  0xde   : > { %p3038_p8 = pnand %p3036_p12, %p3367_p4  ;;  %p3044_p1 = scmp.lt.s32.totalorder %s3042_s14, %s3035_s29 }
  0xe0   : > { %p3039_p9 = pneg %p3038_p8  ;;  %p3045_p3 = por %p3044_p1, %p3043_p2 }
  0xe2   : > { %p3046_p5 = pnand %p3045_p3, %p3039_p9 }
  0xe4   : > { %3049 = shalt.err (!%p3046_p5)
}
  0xe5   : > { %2737 = dma.hbm_to_vmem [thread:$0]  (!%p3347_p0), %s616_s27, 768, %s619_s28, %s3401_s8  }
  0xe6   : > { %p3989_p6 = scmp.ne.s32.totalorder %s3972_s20, 0 }
  0xe7   : > { %s3510_s25 = sand.u32 (!%p3989_p6), 1, %s3122_s24   ;;  %p3990_p4 = scmp.ne.s32.totalorder (!%p3989_p6), %s3967_s17, 0 }
  0xe8   : > { %633 = sbr.rel (%p3989_p6) target bundleno = 1530 (0x5fa), region = 84  ;;  %s2366_s18 = sshll.u32 (!%p3989_p6), %s3510_s25, 5 }
  0xe9   : > { %s636_s4 = scalar_lea.sflag (!%p3989_p6), [#allocation4], %s3510_s25  ;;  %s3514_s9 = scalar_lea.vmem (!%p3989_p6), [#allocation3], %s2366_s18 }
  0xed   : > { %3093 = dma.done.wait (%p3990_p4), %s636_s4, 512  }
  0xee   : > { %3095 = vsyncadd (%p3990_p4), %s636_s4, 4294966784  ;;  %s644_s8 = sand.u32 1, %s3259_s15   ;;  %s2367_s20 = sshll.u32 %s3510_s25, 8 }
  0xef   : > { %s645_s16 = scalar_lea.sflag [#allocation7], %s644_s8  ;;  %s3522_s6 = scalar_lea.vmem [#allocation6], %s2367_s20 }
  0xf0   : > { %3097 = dma.done.wait (%p3990_p4), %s645_s16, 4224  }
  0xf1   : > { %3099 = vsyncadd (%p3990_p4), %s645_s16, 4294963072  ;;  %s2368_s22 = sshll.u32 %s3510_s25, 3  ;;  %s2679_s27 = smul.u32 6, %s3510_s25 }
  0xf2   : > { %s657_s21 = scalar_lea.vmem [#allocation8], %s2368_s22  ;;  %s663_s28 = scalar_lea.sflag [#allocation10], %s644_s8 }
  0xf3   : > { %s3530_s13 = scalar_lea.vmem [#allocation9], %s2679_s27 }
  0xf4   : > { %3101 = dma.done.wait (%p3990_p4), %s663_s28, 864  }
  0xf5   : > { %3103 = vsyncadd (%p3990_p4), %s663_s28, 4294966432  ;;  %s2680_s30 = smul.u32 48, %s3510_s25  ;;  %p3991_p0 = scmp.eq.s32.totalorder %s3259_s15, 0 }
  0xf7   : > { %s3537_s19 = scalar_lea.vmem [#allocation11], %s2680_s30 }
  0xf8   : > { %3105 = dma.done.wait (%p3991_p0), [#allocation13], 20480   ;;  %p3992_p11 = pmov %p3991_p0 }
  0xf9   : > { %p3993_p7 = pmov %p3991_p0 }
  0xfa   : > { %3107 = vsyncadd (%p3992_p11), [#allocation13], 4294946816 }
  0xfb   : > { %3109 = dma.done.wait (%p3993_p7), [#allocation16], 4096   ;;  %p3994_p10 = pmov %p3991_p0 }
  0xfc   : > { %v3948_v0 = vlaneseq  ;;  %v3562_v6 = vld [vmem:[%s657_s21] sm:$0xff]  ;;  %v1248_v7 = vld [vmem:[#allocation12 + $0xf8] sm:$0xff]  ;;  %p765_p13 = scmp.lt.s32.totalorder %s3259_s15, 1  ;;  %vm1139_vm0 = vcmask 64512   ;;  %vm1132_vm1 = vcmask 57344   ;;  %vm1178_vm2 = vcmask 1041409  }
  0xfd   : > { %3111 = vsyncadd (%p3994_p10), [#allocation16], 4294963200  ;;  %2381 = vmatprep.subr.mxu0 %v1248_v7  ;;  %v1232_v10 = vld [vmem:[#allocation12 + $0x78] sm:$0xff]  ;;  %v1247_v12 = vld [vmem:[#allocation12 + $0xf0] sm:$0xff]  ;;  %vm1180_vm3 = vcmask 1042434   ;;  %vm1182_vm4 = vcmask 1043459  }
  0xfe   : > { %v3548_v1 = vshrl.u32 %v3948_v0, 7  ;;  %v1280_v11 = vld [vmem:[#allocation12 + $0x1f8] sm:$0xff]  ;;  %2382 = vmatpush3.msra.mxu0 %v1232_v10  ;;  %v1231_v14 = vld [vmem:[#allocation12 + $0x70] sm:$0xff]  ;;  %s3582_s17 = scalar_select %p765_p13, %s3259_s15, 1  ;;  %v1246_v20 = vld [vmem:[#allocation12 + $0xe8] sm:$0xff]  ;;  %vm1184_vm5 = vcmask 1044484  }
  0xff   : > { %v1264_v13 = vld [vmem:[#allocation12 + $0x178] sm:$0xff]  ;;  %v1279_v19 = vld [vmem:[#allocation12 + $0x1f0] sm:$0xff]  ;;  %2419 = vmatprep.subr.mxu1 %v1280_v11  ;;  %2383 = vmatprep.subr.mxu0 %v1247_v12  ;;  %v1230_v23 = vld [vmem:[#allocation12 + $0x68] sm:$0xff]  ;;  %vm1186_vm6 = vcmask 1045509   ;;  %vm1188_vm7 = vcmask 1046534   ;;  %vm1190_vm8 = vcmask 1047559  }
 0x100   : > { %v3551_v2 = vsub.s32 2, %v3548_v1  ;;  %v3554_v3 = vsub.s32 0, %v3548_v1  ;;  %v3557_v4 = vsub.s32 3, %v3548_v1  ;;  %v3560_v5 = vsub.s32 1, %v3548_v1  ;;  %2420 = vmatpush3.msra.mxu1 %v1264_v13  ;;  %2384 = vmatpush3.msra.mxu0 %v1231_v14  ;;  %v1263_v22 = vld [vmem:[#allocation12 + $0x170] sm:$0xff]  ;;  %v1278_v24 = vld [vmem:[#allocation12 + $0x1e8] sm:$0xff]  ;;  %s767_s10 = scalar_lea.vmem %s3910_s1, %s3582_s17 }
 0x101   : > { %v3574_v17 = vsub.s32 5, %v3548_v1  ;;  %v3577_v18 = vsub.s32 4, %v3548_v1  ;;  %v3949_v21 = vsub.s32 7, %v3548_v1  ;;  %2421 = vmatprep.subr.mxu1 %v1279_v19  ;;  %2385 = vmatprep.subr.mxu0 %v1246_v20  ;;  %v3950_v27 = vsub.s32 6, %v3548_v1  ;;  %v1245_v28 = vld [vmem:[#allocation12 + $0xe0] sm:$0xff]  ;;  %v1262_v29 = vld [vmem:[#allocation12 + $0x168] sm:$0xff] }
 0x102   : > { %v869_v8 = vrot.slane %v3562_v6, %v3551_v2  ;;  %v855_v9 = vrot.slane %v3562_v6, %v3554_v3  ;;  %v876_v15 = vrot.slane %v3562_v6, %v3557_v4  ;;  %v862_v16 = vrot.slane %v3562_v6, %v3560_v5  ;;  %v1229_v30 = vld [vmem:[#allocation12 + $0x60] sm:$0xff]  ;;  %2422 = vmatpush3.msra.mxu1 %v1263_v22  ;;  %v1244_v34 = vld [vmem:[#allocation12 + $0xd8] sm:$0xff]  ;;  %v1243_v39 = vld [vmem:[#allocation12 + $0xd0] sm:$0xff]  ;;  %s3999_s7 = sld [smem:[#allocation36_spill]]  ;;  %s764_s0 = scalar_lea.vmem [#allocation18], %s3510_s25 }
 0x103   : > { %v890_v25 = vrot.slane %v3562_v6, %v3574_v17  ;;  %v883_v26 = vrot.slane %v3562_v6, %v3577_v18  ;;  %2386 = vmatpush3.msra.mxu0 %v1230_v23  ;;  %2423 = vmatprep.subr.mxu1 %v1278_v24  ;;  %v1277_v31 = vld [vmem:[#allocation12 + $0x1e0] sm:$0xff]  ;;  %v904_v32 = vrot.slane %v3562_v6, %v3949_v21  ;;  %v1228_v36 = vld [vmem:[#allocation12 + $0x58] sm:$0xff]  ;;  %v1227_v41 = vld [vmem:[#allocation12 + $0x50] sm:$0xff]  ;;  %vm3146_vm9 = vmmov 0   ;;  %s4000_s4 = sld [smem:[#allocation38_spill]]  ;;  %s2140_s23 = sshll.u32 %s764_s0, 4  ;;  %s2141_s23 = int_to_ptr.vmem [resolvable:$true] %s2140_s23 }
 0x104   : > { %871 = vbcast.lane.b32.xlu1 %v869_v8, 256  ;;  %857 = vbcast.lane.b32.xlu0 %v855_v9, 256  ;;  %v897_v33 = vrot.slane %v3562_v6, %v3950_v27  ;;  %v1261_v35 = vld [vmem:[#allocation12 + $0x160] sm:$0xff]  ;;  %v1276_v38 = vld [vmem:[#allocation12 + $0x1d8] sm:$0xff]  ;;  %v1275_v42 = vld [vmem:[#allocation12 + $0x1d0] sm:$0xff]  ;;  %s4001_s20 = sld [smem:[#allocation40_spill]] }
 0x105   : > { %2387 = vmatprep.subr.mxu0 %v1245_v28  ;;  %2424 = vmatpush3.msra.mxu1 %v1262_v29  ;;  %v3600_v37 = vld [vmem:[%s767_s10] sm:$0x1]  ;;  %v1260_v40 = vld [vmem:[#allocation12 + $0x158] sm:$0xff]  ;;  %v1242_v44 = vld [vmem:[#allocation12 + $0xc8] sm:$0xff]  ;;  %s4002_s22 = sld [smem:[#allocation41_spill]]  ;;  %s2128_s14 = scalar_lea.sflag [#allocation5], %s3510_s25 }
 0x106   : > { %2388 = vmatpush3.msra.mxu0 %v1229_v30  ;;  %2425 = vmatprep.subr.mxu1 %v1277_v31  ;;  %v820_v43 = vrot.slane %v3600_v37, %v3554_v3  ;;  %v1259_v45 = vld [vmem:[#allocation12 + $0x150] sm:$0xff]  ;;  %v1226_v46 = vld [vmem:[#allocation12 + $0x48] sm:$0xff]  ;;  %v1241_v48 = vld [vmem:[#allocation12 + $0xc0] sm:$0xff]  ;;  %s2002_s27 = sld [smem:[#allocation2]]  ;;  %s3050_s18 = scalar_lea.vmem %s2141_s23, 16 }
 0x107   : > { %2389 = vmatprep.subr.mxu0 %v1244_v34  ;;  %2426 = vmatpush3.msra.mxu1 %v1261_v35  ;;  %v1274_v47 = vld [vmem:[#allocation12 + $0x1c8] sm:$0xff]  ;;  %v1225_v50 = vld [vmem:[#allocation12 + $0x40] sm:$0xff]  ;;  %v1240_v52 = vld [vmem:[#allocation12 + $0xb8] sm:$0xff]  ;;  %v1140_v34 = vsel %vm1139_vm0, %v3562_v6, 0.0  ;;  %v1133_v35 = vsel %vm1132_vm1, %v3600_v37, 0.0  ;;  %s4008_s11 = sld [smem:[#allocation42_spill]]  ;;  %p3051_p12 = scmp.ne.s32.totalorder %s2141_s23, %s3050_s18 }
 0x108   : > { %878 = vbcast.lane.b32.xlu1 %v876_v15, 256  ;;  %864 = vbcast.lane.b32.xlu0 %v862_v16, 256  ;;  %v1258_v49 = vld [vmem:[#allocation12 + $0x148] sm:$0xff]  ;;  %v1273_v51 = vld [vmem:[#allocation12 + $0x1c0] sm:$0xff]  ;;  %v1224_v54 = vld [vmem:[#allocation12 + $0x38] sm:$0xff] }
 0x109   : > { %2390 = vmatpush3.msra.mxu0 %v1228_v36  ;;  %2427 = vmatprep.subr.mxu1 %v1276_v38  ;;  %v1257_v53 = vld [vmem:[#allocation12 + $0x140] sm:$0xff]  ;;  %v1272_v55 = vld [vmem:[#allocation12 + $0x1b8] sm:$0xff]  ;;  %v1239_v56 = vld [vmem:[#allocation12 + $0xb0] sm:$0xff] }
 0x10a   : > { %2391 = vmatprep.subr.mxu0 %v1243_v39  ;;  %2428 = vmatpush3.msra.mxu1 %v1260_v40  ;;  %v1256_v57 = vld [vmem:[#allocation12 + $0x138] sm:$0xff]  ;;  %v1223_v58 = vld [vmem:[#allocation12 + $0x30] sm:$0xff]  ;;  %v1238_v60 = vld [vmem:[#allocation12 + $0xa8] sm:$0xff] }
 0x10b   : > { %2392 = vmatpush3.msra.mxu0 %v1227_v41  ;;  %2429 = vmatprep.subr.mxu1 %v1275_v42  ;;  %v1271_v59 = vld [vmem:[#allocation12 + $0x1b0] sm:$0xff]  ;;  %v1222_v62 = vld [vmem:[#allocation12 + $0x28] sm:$0xff]  ;;  %v1237_v7 = vld [vmem:[#allocation12 + $0xa0] sm:$0xff] }
 0x10c   : > { %892 = vbcast.lane.b32.xlu1 %v890_v25, 256  ;;  %885 = vbcast.lane.b32.xlu0 %v883_v26, 256  ;;  %v1255_v61 = vld [vmem:[#allocation12 + $0x130] sm:$0xff]  ;;  %v1270_v63 = vld [vmem:[#allocation12 + $0x1a8] sm:$0xff]  ;;  %v1221_v9 = vld [vmem:[#allocation12 + $0x20] sm:$0xff] }
 0x10d   : > { %2393 = vmatprep.subr.mxu0 %v1242_v44  ;;  %2430 = vmatpush3.msra.mxu1 %v1259_v45  ;;  %v1254_v8 = vld [vmem:[#allocation12 + $0x128] sm:$0xff]  ;;  %v1269_v10 = vld [vmem:[#allocation12 + $0x1a0] sm:$0xff]  ;;  %v1236_v11 = vld [vmem:[#allocation12 + $0x98] sm:$0xff] }
 0x10e   : > { %2394 = vmatpush3.msra.mxu0 %v1226_v46  ;;  %2431 = vmatprep.subr.mxu1 %v1274_v47  ;;  %v1253_v12 = vld [vmem:[#allocation12 + $0x120] sm:$0xff]  ;;  %v1220_v13 = vld [vmem:[#allocation12 + $0x18] sm:$0xff]  ;;  %v1235_v15 = vld [vmem:[#allocation12 + $0x90] sm:$0xff] }
 0x10f   : > { %2395 = vmatprep.subr.mxu0 %v1241_v48  ;;  %2432 = vmatpush3.msra.mxu1 %v1258_v49  ;;  %v1268_v14 = vld [vmem:[#allocation12 + $0x198] sm:$0xff]  ;;  %v1219_v19 = vld [vmem:[#allocation12 + $0x10] sm:$0xff]  ;;  %v1234_v22 = vld [vmem:[#allocation12 + $0x88] sm:$0xff] }
 0x110   : > { %906 = vbcast.lane.b32.xlu1 %v904_v32, 256  ;;  %899 = vbcast.lane.b32.xlu0 %v897_v33, 256  ;;  %v1252_v16 = vld [vmem:[#allocation12 + $0x118] sm:$0xff]  ;;  %v1267_v20 = vld [vmem:[#allocation12 + $0x190] sm:$0xff]  ;;  %v1218_v24 = vld [vmem:[#allocation12 + $0x8] sm:$0xff] }
 0x111   : > { %2396 = vmatpush3.msra.mxu0 %v1225_v50  ;;  %2433 = vmatprep.subr.mxu1 %v1273_v51  ;;  %v1251_v23 = vld [vmem:[#allocation12 + $0x110] sm:$0xff]  ;;  %v1266_v25 = vld [vmem:[#allocation12 + $0x188] sm:$0xff]  ;;  %v1233_v26 = vld [vmem:[#allocation12 + $0x80] sm:$0xff] }
 0x112   : > { %2397 = vmatprep.subr.mxu0 %v1240_v52  ;;  %2434 = vmatpush3.msra.mxu1 %v1257_v53  ;;  %v1250_v28 = vld [vmem:[#allocation12 + $0x108] sm:$0xff]  ;;  %v1217_v29 = vld [vmem:[#allocation12] sm:$0xff]  ;;  %v1509_v32 = vld [vmem:[#allocation14 + $0xf8] sm:$0xff] }
 0x113   : > { %2398 = vmatpush3.msra.mxu0 %v1224_v54  ;;  %2435 = vmatprep.subr.mxu1 %v1272_v55  ;;  %v1265_v30 = vld [vmem:[#allocation12 + $0x180] sm:$0xff]  ;;  %v1541_v33 = vld [vmem:[#allocation14 + $0x1f8] sm:$0xff]  ;;  %v784_v38 = vld [vmem:[%s3522_s6 + $0x48] sm:$0xff] }
 0x114   : > { %822 = vbcast.lane.b32.xlu0 %v820_v43, 256  ;;  %2399 = vmatprep.subr.mxu0 %v1239_v56  ;;  %v1249_v31 = vld [vmem:[#allocation12 + $0x100] sm:$0xff]  ;;  %v785_v39 = vld [vmem:[%s3522_s6 + $0x50] sm:$0xff]  ;;  %v776_v42 = vld [vmem:[%s3522_s6 + $0x8] sm:$0xff] }
 0x115   : > { %2436 = vmatpush3.msra.mxu1 %v1256_v57  ;;  %2400 = vmatpush3.msra.mxu0 %v1223_v58  ;;  %v783_v36 = vld [vmem:[%s3522_s6 + $0x40] sm:$0xff]  ;;  %v786_v40 = vld [vmem:[%s3522_s6 + $0x58] sm:$0xff]  ;;  %v777_v43 = vld [vmem:[%s3522_s6 + $0x10] sm:$0xff] }
 0x116   : > { %2437 = vmatprep.subr.mxu1 %v1271_v59  ;;  %2401 = vmatprep.subr.mxu0 %v1238_v60  ;;  %v775_v41 = vld [vmem:[%s3522_s6] sm:$0xff]  ;;  %v778_v44 = vld [vmem:[%s3522_s6 + $0x18] sm:$0xff] }
 0x117   : > { %2438 = vmatpush3.msra.mxu1 %v1255_v61  ;;  %2402 = vmatpush3.msra.mxu0 %v1222_v62 }
 0x118   : > { %2439 = vmatprep.subr.mxu1 %v1270_v63  ;;  %2403 = vmatprep.subr.mxu0 %v1237_v7 }
 0x119   : > { %2440 = vmatpush3.msra.mxu1 %v1254_v8  ;;  %2404 = vmatpush3.msra.mxu0 %v1221_v9 }
 0x11a   : > { %2441 = vmatprep.subr.mxu1 %v1269_v10  ;;  %2405 = vmatprep.subr.mxu0 %v1236_v11 }
 0x11b   : > { %2442 = vmatpush3.msra.mxu1 %v1253_v12  ;;  %2406 = vmatpush3.msra.mxu0 %v1220_v13 }
 0x11c   : > { %2443 = vmatprep.subr.mxu1 %v1268_v14  ;;  %2407 = vmatprep.subr.mxu0 %v1235_v15 }
 0x11d   : > { %2444 = vmatpush3.msra.mxu1 %v1252_v16  ;;  %2408 = vmatpush3.msra.mxu0 %v1219_v19 }
 0x11e   : > { %2445 = vmatprep.subr.mxu1 %v1267_v20  ;;  %2409 = vmatprep.subr.mxu0 %v1234_v22 }
 0x11f   : > { %2446 = vmatpush3.msra.mxu1 %v1251_v23  ;;  %2410 = vmatpush3.msra.mxu0 %v1218_v24 }
 0x120   : > { %2447 = vmatprep.subr.mxu1 %v1266_v25  ;;  %2411 = vmatprep.subr.mxu0 %v1233_v26 }
 0x121   : > { %2448 = vmatpush3.msra.mxu1 %v1250_v28  ;;  %2412 = vmatpush3.msra.mxu0 %v1217_v29 }
 0x122   : > { %2449 = vmatprep.subr.mxu1 %v1265_v30  ;;  %2457 = vmatprep.subr.mxu0 %v1509_v32  ;;  %v787_v32 = vld [vmem:[%s3522_s6 + $0x60] sm:$0xff] }
 0x123   : > { %2450 = vmatpush3.msra.mxu1 %v1249_v31 }
 0x124   : > { %2495 = vmatprep.subr.mxu1 %v1541_v33 }
 0x133   : > { %1141 = vadd.xlane.f32.xlu0 %v1140_v34 }
 0x134   : > { %1134 = vadd.xlane.f32.xlu1 %v1133_v35 }
 0x176   : > { %v872_v45 = vpop.permute.xlu1 %871  ;;  %v858_v46 = vpop.permute.xlu0 %857 }
 0x177   : > { %v916_v47 = vmul.f32 %v872_v45, %v783_v36  ;;  %v917_v48 = vmul.f32 %v872_v45, %v784_v38  ;;  %v918_v49 = vmul.f32 %v872_v45, %v785_v39  ;;  %v919_v6 = vmul.f32 %v872_v45, %v786_v40  ;;  %v788_v38 = vld [vmem:[%s3522_s6 + $0x68] sm:$0xff]  ;;  %v789_v39 = vld [vmem:[%s3522_s6 + $0x70] sm:$0xff]  ;;  %v790_v45 = vld [vmem:[%s3522_s6 + $0x78] sm:$0xff] }
 0x178   : > { %v908_v50 = vmul.f32 %v858_v46, %v775_v41  ;;  %v909_v51 = vmul.f32 %v858_v46, %v776_v42  ;;  %v910_v52 = vmul.f32 %v858_v46, %v777_v43  ;;  %v911_v53 = vmul.f32 %v858_v46, %v778_v44  ;;  %v779_v46 = vld [vmem:[%s3522_s6 + $0x20] sm:$0xff] }
 0x179   : > { %v988_v37 = vrot.slane %v916_v47, 4  ;;  %v994_v54 = vrot.slane %v917_v48, 4  ;;  %v1000_v55 = vrot.slane %v918_v49, 4  ;;  %v1006_v56 = vrot.slane %v919_v6, 4 }
 0x17a   : > { %v940_v57 = vrot.slane %v908_v50, 4  ;;  %v946_v58 = vrot.slane %v909_v51, 4  ;;  %v952_v59 = vrot.slane %v910_v52, 4  ;;  %v958_v60 = vrot.slane %v911_v53, 4  ;;  %v879_v44 = vpop.permute.xlu1 %878 }
 0x17b   : > { %v989_v61 = vadd.f32 %v988_v37, %v916_v47  ;;  %v995_v62 = vadd.f32 %v994_v54, %v917_v48  ;;  %v1001_v63 = vadd.f32 %v1000_v55, %v918_v49  ;;  %v1007_v7 = vadd.f32 %v1006_v56, %v919_v6 }
 0x17c   : > { %v941_v8 = vadd.f32 %v940_v57, %v908_v50  ;;  %v947_v9 = vadd.f32 %v946_v58, %v909_v51  ;;  %v953_v10 = vadd.f32 %v952_v59, %v910_v52  ;;  %v959_v11 = vadd.f32 %v958_v60, %v911_v53  ;;  %v865_v50 = vpop.permute.xlu0 %864  ;;  %v780_v51 = vld [vmem:[%s3522_s6 + $0x28] sm:$0xff]  ;;  %v781_v52 = vld [vmem:[%s3522_s6 + $0x30] sm:$0xff]  ;;  %v782_v53 = vld [vmem:[%s3522_s6 + $0x38] sm:$0xff] }
 0x17d   : > { %v990_v12 = vrot.slane %v989_v61, 2  ;;  %v996_v13 = vrot.slane %v995_v62, 2  ;;  %v1002_v14 = vrot.slane %v1001_v63, 2  ;;  %v1008_v15 = vrot.slane %v1007_v7, 2 }
 0x17e   : > { %v942_v16 = vrot.slane %v941_v8, 2  ;;  %v948_v19 = vrot.slane %v947_v9, 2  ;;  %v954_v20 = vrot.slane %v953_v10, 2  ;;  %v960_v22 = vrot.slane %v959_v11, 2 }
 0x17f   : > { %v991_v23 = vadd.f32 %v990_v12, %v989_v61  ;;  %v997_v24 = vadd.f32 %v996_v13, %v995_v62  ;;  %v1003_v25 = vadd.f32 %v1002_v14, %v1001_v63  ;;  %v1009_v26 = vadd.f32 %v1008_v15, %v1007_v7 }
 0x180   : > { %v943_v28 = vadd.f32 %v942_v16, %v941_v8  ;;  %v949_v29 = vadd.f32 %v948_v19, %v947_v9  ;;  %v955_v30 = vadd.f32 %v954_v20, %v953_v10  ;;  %v961_v31 = vadd.f32 %v960_v22, %v959_v11 }
 0x181   : > { %v992_v33 = vrot.slane %v991_v23, 1  ;;  %v998_v34 = vrot.slane %v997_v24, 1  ;;  %v1004_v35 = vrot.slane %v1003_v25, 1  ;;  %v1010_v36 = vrot.slane %v1009_v26, 1 }
 0x182   : > { %v944_v40 = vrot.slane %v943_v28, 1  ;;  %v950_v41 = vrot.slane %v949_v29, 1  ;;  %v956_v42 = vrot.slane %v955_v30, 1  ;;  %v962_v43 = vrot.slane %v961_v31, 1 }
 0x183   : > { %v3620_v47 = vadd.f32 %v992_v33, %v991_v23  ;;  %v3622_v48 = vadd.f32 %v998_v34, %v997_v24  ;;  %v3624_v49 = vadd.f32 %v1004_v35, %v1003_v25  ;;  %v3626_v6 = vadd.f32 %v1010_v36, %v1009_v26 }
 0x184   : > { %v3631_v37 = vadd.f32 %v944_v40, %v943_v28  ;;  %v3633_v54 = vadd.f32 %v950_v41, %v949_v29  ;;  %v3635_v55 = vadd.f32 %v956_v42, %v955_v30  ;;  %v3637_v56 = vadd.f32 %v962_v43, %v961_v31 }
 0x185   : > { %v920_v57 = vmul.f32 %v879_v44, %v787_v32  ;;  %v921_v58 = vmul.f32 %v879_v44, %v788_v38  ;;  %v922_v59 = vmul.f32 %v879_v44, %v789_v39  ;;  %v923_v60 = vmul.f32 %v879_v44, %v790_v45  ;;  %v795_v45 = vld [vmem:[%s3522_s6 + $0xa0] sm:$0xff] }
 0x186   : > { %v912_v61 = vmul.f32 %v865_v50, %v779_v46  ;;  %v913_v62 = vmul.f32 %v865_v50, %v780_v51  ;;  %v914_v63 = vmul.f32 %v865_v50, %v781_v52  ;;  %v915_v7 = vmul.f32 %v865_v50, %v782_v53  ;;  %v796_v53 = vld [vmem:[%s3522_s6 + $0xa8] sm:$0xff] }
 0x187   : > { %v1012_v8 = vrot.slane %v920_v57, 4  ;;  %v1018_v9 = vrot.slane %v921_v58, 4  ;;  %v1024_v10 = vrot.slane %v922_v59, 4  ;;  %v1030_v11 = vrot.slane %v923_v60, 4 }
 0x188   : > { %v964_v12 = vrot.slane %v912_v61, 4  ;;  %v970_v13 = vrot.slane %v913_v62, 4  ;;  %v976_v14 = vrot.slane %v914_v63, 4  ;;  %v982_v15 = vrot.slane %v915_v7, 4 }
 0x189   : > { %v1013_v16 = vadd.f32 %v1012_v8, %v920_v57  ;;  %v1019_v19 = vadd.f32 %v1018_v9, %v921_v58  ;;  %v1025_v20 = vadd.f32 %v1024_v10, %v922_v59  ;;  %v1031_v22 = vadd.f32 %v1030_v11, %v923_v60  ;;  %v797_v57 = vld [vmem:[%s3522_s6 + $0xb0] sm:$0xff] }
 0x18a   : > { %v965_v23 = vadd.f32 %v964_v12, %v912_v61  ;;  %v971_v24 = vadd.f32 %v970_v13, %v913_v62  ;;  %v977_v25 = vadd.f32 %v976_v14, %v914_v63  ;;  %v983_v26 = vadd.f32 %v982_v15, %v915_v7  ;;  %v893_v62 = vpop.permute.xlu1 %892  ;;  %v798_v63 = vld [vmem:[%s3522_s6 + $0xb8] sm:$0xff]  ;;  %v791_v7 = vld [vmem:[%s3522_s6 + $0x80] sm:$0xff]  ;;  %v886_v12 = vpop.permute.xlu0 %885  ;;  %v792_v13 = vld [vmem:[%s3522_s6 + $0x88] sm:$0xff] }
 0x18b   : > { %v1014_v28 = vrot.slane %v1013_v16, 2  ;;  %v1020_v29 = vrot.slane %v1019_v19, 2  ;;  %v1026_v30 = vrot.slane %v1025_v20, 2  ;;  %v1032_v31 = vrot.slane %v1031_v22, 2  ;;  %v793_v14 = vld [vmem:[%s3522_s6 + $0x90] sm:$0xff]  ;;  %v794_v15 = vld [vmem:[%s3522_s6 + $0x98] sm:$0xff] }
 0x18c   : > { %v966_v32 = vrot.slane %v965_v23, 2  ;;  %v972_v33 = vrot.slane %v971_v24, 2  ;;  %v978_v34 = vrot.slane %v977_v25, 2  ;;  %v984_v35 = vrot.slane %v983_v26, 2 }
 0x18d   : > { %v1015_v36 = vadd.f32 %v1014_v28, %v1013_v16  ;;  %v1021_v38 = vadd.f32 %v1020_v29, %v1019_v19  ;;  %v1027_v39 = vadd.f32 %v1026_v30, %v1025_v20  ;;  %v1033_v40 = vadd.f32 %v1032_v31, %v1031_v22 }
 0x18e   : > { %v967_v41 = vadd.f32 %v966_v32, %v965_v23  ;;  %v973_v42 = vadd.f32 %v972_v33, %v971_v24  ;;  %v979_v43 = vadd.f32 %v978_v34, %v977_v25  ;;  %v985_v44 = vadd.f32 %v984_v35, %v983_v26 }
 0x18f   : > { %v1016_v46 = vrot.slane %v1015_v36, 1  ;;  %v1022_v50 = vrot.slane %v1021_v38, 1  ;;  %v1028_v51 = vrot.slane %v1027_v39, 1  ;;  %v1034_v52 = vrot.slane %v1033_v40, 1 }
 0x190   : > { %v968_v58 = vrot.slane %v967_v41, 1  ;;  %v974_v59 = vrot.slane %v973_v42, 1  ;;  %v980_v60 = vrot.slane %v979_v43, 1  ;;  %v986_v61 = vrot.slane %v985_v44, 1 }
 0x191   : > { %v3644_v8 = vadd.f32 %v1016_v46, %v1015_v36  ;;  %v3646_v9 = vadd.f32 %v1022_v50, %v1021_v38  ;;  %v3648_v10 = vadd.f32 %v1028_v51, %v1027_v39  ;;  %v3650_v11 = vadd.f32 %v1034_v52, %v1033_v40 }
 0x192   : > { %v3655_v16 = vadd.f32 %v968_v58, %v967_v41  ;;  %v3657_v19 = vadd.f32 %v974_v59, %v973_v42  ;;  %v3659_v20 = vadd.f32 %v980_v60, %v979_v43  ;;  %v3661_v22 = vadd.f32 %v986_v61, %v985_v44 }
 0x193   : > { %v928_v23 = vmul.f32 %v893_v62, %v795_v45  ;;  %v929_v24 = vmul.f32 %v893_v62, %v796_v53  ;;  %v930_v25 = vmul.f32 %v893_v62, %v797_v57  ;;  %v931_v26 = vmul.f32 %v893_v62, %v798_v63  ;;  %v907_v63 = vpop.permute.xlu1 %906 }
 0x194   : > { %v924_v28 = vmul.f32 %v886_v12, %v791_v7  ;;  %v925_v29 = vmul.f32 %v886_v12, %v792_v13  ;;  %v926_v30 = vmul.f32 %v886_v12, %v793_v14  ;;  %v927_v31 = vmul.f32 %v886_v12, %v794_v15  ;;  %v803_v7 = vld [vmem:[%s3522_s6 + $0xe0] sm:$0xff]  ;;  %v804_v12 = vld [vmem:[%s3522_s6 + $0xe8] sm:$0xff] }
 0x195   : > { %v1060_v32 = vrot.slane %v928_v23, 4  ;;  %v1066_v33 = vrot.slane %v929_v24, 4  ;;  %v1072_v34 = vrot.slane %v930_v25, 4  ;;  %v1078_v35 = vrot.slane %v931_v26, 4 }
 0x196   : > { %v1036_v36 = vrot.slane %v924_v28, 4  ;;  %v1042_v38 = vrot.slane %v925_v29, 4  ;;  %v1048_v39 = vrot.slane %v926_v30, 4  ;;  %v1054_v40 = vrot.slane %v927_v31, 4 }
 0x197   : > { %v1061_v41 = vadd.f32 %v1060_v32, %v928_v23  ;;  %v1067_v42 = vadd.f32 %v1066_v33, %v929_v24  ;;  %v1073_v43 = vadd.f32 %v1072_v34, %v930_v25  ;;  %v1079_v44 = vadd.f32 %v1078_v35, %v931_v26 }
 0x198   : > { %v1037_v45 = vadd.f32 %v1036_v36, %v924_v28  ;;  %v1043_v46 = vadd.f32 %v1042_v38, %v925_v29  ;;  %v1049_v50 = vadd.f32 %v1048_v39, %v926_v30  ;;  %v1055_v51 = vadd.f32 %v1054_v40, %v927_v31  ;;  %v805_v29 = vld [vmem:[%s3522_s6 + $0xf0] sm:$0xff]  ;;  %v806_v30 = vld [vmem:[%s3522_s6 + $0xf8] sm:$0xff]  ;;  %v900_v31 = vpop.permute.xlu0 %899  ;;  %v799_v36 = vld [vmem:[%s3522_s6 + $0xc0] sm:$0xff] }
 0x199   : > { %v1062_v52 = vrot.slane %v1061_v41, 2  ;;  %v1068_v53 = vrot.slane %v1067_v42, 2  ;;  %v1074_v57 = vrot.slane %v1073_v43, 2  ;;  %v1080_v58 = vrot.slane %v1079_v44, 2  ;;  %v800_v38 = vld [vmem:[%s3522_s6 + $0xc8] sm:$0xff] }
 0x19a   : > { %v1038_v59 = vrot.slane %v1037_v45, 2  ;;  %v1044_v60 = vrot.slane %v1043_v46, 2  ;;  %v1050_v61 = vrot.slane %v1049_v50, 2  ;;  %v1056_v62 = vrot.slane %v1055_v51, 2 }
 0x19b   : > { %v3665_v13 = vadd.f32 %v1062_v52, %v1061_v41  ;;  %v3667_v14 = vadd.f32 %v1068_v53, %v1067_v42  ;;  %v3669_v15 = vadd.f32 %v1074_v57, %v1073_v43  ;;  %v3671_v23 = vadd.f32 %v1080_v58, %v1079_v44 }
 0x19c   : > { %v1039_v24 = vadd.f32 %v1038_v59, %v1037_v45  ;;  %v3673_v25 = vadd.f32 %v1044_v60, %v1043_v46  ;;  %v1051_v26 = vadd.f32 %v1050_v61, %v1049_v50  ;;  %v3675_v28 = vadd.f32 %v1056_v62, %v1055_v51  ;;  %v801_v50 = vld [vmem:[%s3522_s6 + $0xd0] sm:$0xff]  ;;  %v802_v51 = vld [vmem:[%s3522_s6 + $0xd8] sm:$0xff]  ;;  %v823_v59 = vpop.permute.xlu0 %822  ;;  %v771_v60 = vld [vmem:[%s3514_s9] sm:$0xff] }
 0x19d   : > { %v936_v34 = vmul.f32 %v907_v63, %v803_v7  ;;  %v937_v35 = vmul.f32 %v907_v63, %v804_v12  ;;  %v938_v43 = vmul.f32 %v907_v63, %v805_v29  ;;  %v939_v44 = vmul.f32 %v907_v63, %v806_v30 }
 0x19e   : > { %v1040_v39 = vrot.slane %v1039_v24, 1  ;;  %v1046_v40 = vrot.slane %v3673_v25, 1  ;;  %v1052_v41 = vrot.slane %v1051_v26, 1  ;;  %v932_v57 = vmul.f32 %v900_v31, %v799_v36 }
 0x19f   : > { %v1108_v45 = vrot.slane %v936_v34, 4  ;;  %v1114_v46 = vrot.slane %v937_v35, 4  ;;  %v933_v58 = vmul.f32 %v900_v31, %v800_v38  ;;  %v1120_v63 = vrot.slane %v938_v43, 4 }
 0x1a0   : > { %v3687_v52 = vadd.f32 %v1040_v39, %v1039_v24  ;;  %v3689_v53 = vadd.f32 %v1052_v41, %v1051_v26  ;;  %v1126_v7 = vrot.slane %v939_v44, 4  ;;  %v934_v12 = vmul.f32 %v900_v31, %v801_v50  ;;  %v772_v39 = vld [vmem:[%s3514_s9 + $0x8] sm:$0xff]  ;;  %v773_v26 = vld [vmem:[%s3514_s9 + $0x10] sm:$0xff]  ;;  %v774_v41 = vld [vmem:[%s3514_s9 + $0x18] sm:$0xff] }
 0x1a1   : > { %v3692_v61 = vadd.f32 %v1108_v45, %v936_v34  ;;  %v1115_v62 = vadd.f32 %v1114_v46, %v937_v35  ;;  %v935_v29 = vmul.f32 %v900_v31, %v802_v51  ;;  %v1084_v24 = vrot.slane %v932_v57, 4 }
 0x1a2   : > { %v1090_v30 = vrot.slane %v933_v58, 4  ;;  %v3698_v38 = vadd.f32 %v1120_v63, %v938_v43  ;;  %v1127_v0 = vadd.f32 %v1126_v7, %v939_v44  ;;  %v824_v21 = vmul.f32 %v823_v59, %v771_v60 }
 0x1a3   : > { %v1085_v34 = vadd.f32 %v1084_v24, %v932_v57  ;;  %v1096_v45 = vrot.slane %v934_v12, 4  ;;  %v1102_v46 = vrot.slane %v935_v29, 4  ;;  %v825_v50 = vmul.f32 %v823_v59, %v772_v39 }
 0x1a4   : > { %v1091_v35 = vadd.f32 %v1090_v30, %v933_v58  ;;  %v1122_v31 = vrot.slane %v3698_v38, 2  ;;  %v826_v51 = vmul.f32 %v823_v59, %v773_v26  ;;  %v827_v27 = vmul.f32 %v823_v59, %v774_v41 }
 0x1a5   : > { %v1086_v33 = vrot.slane %v1085_v34, 2  ;;  %v1097_v42 = vadd.f32 %v1096_v45, %v934_v12  ;;  %v1103_v36 = vadd.f32 %v1102_v46, %v935_v29  ;;  %v828_v43 = vrot.slane %v824_v21, 4 }
 0x1a6   : > { %v1092_v32 = vrot.slane %v1091_v35, 2  ;;  %v834_v63 = vrot.slane %v825_v50, 4  ;;  %v840_v44 = vrot.slane %v826_v51, 4  ;;  %v846_v60 = vrot.slane %v827_v27, 4 }
 0x1a7   : > { %v1087_v57 = vadd.f32 %v1086_v33, %v1085_v34  ;;  %v1098_v58 = vrot.slane %v1097_v42, 2  ;;  %v1104_v7 = vrot.slane %v1103_v36, 2  ;;  %v1047_v24 = vadd.f32 %v1046_v40, %v3673_v25 }
 0x1a8   : > { %v3702_v30 = vadd.f32 %v828_v43, %v824_v21  ;;  %v3704_v39 = vadd.f32 %v834_v63, %v825_v50  ;;  %v3706_v59 = vadd.f32 %v840_v44, %v826_v51  ;;  %v3708_v26 = vadd.f32 %v846_v60, %v827_v27 }
 0x1a9   : > { %v1099_v12 = vadd.f32 %v1098_v58, %v1097_v42  ;;  %v1070_v29 = vrot.slane %v3667_v14, 1  ;;  %v1093_v41 = vadd.f32 %v1092_v32, %v1091_v35  ;;  %v1116_v45 = vrot.slane %v1115_v62, 2 }
 0x1aa   : > { %v1192_v33 = vsel %vm1178_vm2, %v3657_v19, %v3633_v54  ;;  %v3995_v25 = vrot.slane %v3675_v28, 1  ;;  %v1082_v40 = vrot.slane %v3671_v23, 1  ;;  %v1105_v34 = vadd.f32 %v1104_v7, %v1103_v36 }
 0x1ab   : > { %v1071_v46 = vadd.f32 %v1070_v29, %v3667_v14  ;;  %v1094_v27 = vrot.slane %v1093_v41, 1  ;;  %v1117_v50 = vadd.f32 %v1116_v45, %v1115_v62  ;;  %v1193_v42 = vsel %vm1180_vm3, %v3622_v48, %v1192_v33 }
 0x1ac   : > { %v1059_v21 = vadd.f32 %v3995_v25, %v3675_v28  ;;  %v1194_v32 = vsel %vm1182_vm4, %v3646_v9, %v1193_v42  ;;  %v1083_v35 = vadd.f32 %v1082_v40, %v3671_v23  ;;  %v1106_v54 = vrot.slane %v1105_v34, 1 }
 0x1ad   : > { %v1128_v19 = vrot.slane %v1127_v0, 2  ;;  %v1095_v51 = vadd.f32 %v1094_v27, %v1093_v41  ;;  %v1118_v43 = vrot.slane %v1117_v50, 1  ;;  %v1195_v28 = vsel %vm1184_vm5, %v1047_v24, %v1194_v32 }
 0x1ae   : > { %v1206_v14 = vsel %vm1178_vm2, %v3661_v22, %v3637_v56  ;;  %v1196_v62 = vsel %vm1186_vm6, %v1071_v46, %v1195_v28  ;;  %v1107_v36 = vadd.f32 %v1106_v54, %v1105_v34  ;;  %v3996_v60 = vrot.slane %v3665_v13, 1  ;;  %v1508_v54 = vld [vmem:[#allocation14 + $0xf0] sm:$0xff] }
 0x1af   : > { %v1129_v63 = vadd.f32 %v1128_v19, %v1127_v0  ;;  %v1207_v48 = vsel %vm1180_vm3, %v3626_v6, %v1206_v14  ;;  %v1119_v9 = vadd.f32 %v1118_v43, %v1117_v50  ;;  %v1197_v23 = vsel %vm1188_vm7, %v1095_v51, %v1196_v62  ;;  %v1525_v19 = vld [vmem:[#allocation14 + $0x178] sm:$0xff]  ;;  %v1492_v28 = vld [vmem:[#allocation14 + $0x70] sm:$0xff] }
 0x1b0   : > { %v1208_v44 = vsel %vm1182_vm4, %v3650_v11, %v1207_v48  ;;  %v1065_v58 = vadd.f32 %v3996_v60, %v3665_v13  ;;  %v1088_v22 = vrot.slane %v1087_v57, 1  ;;  %v3997_v0 = vrot.slane %v3692_v61, 2  ;;  %v1540_v14 = vld [vmem:[#allocation14 + $0x1f0] sm:$0xff] }
 0x1b1   : > { %v1130_v7 = vrot.slane %v1129_v63, 1  ;;  %v1209_v56 = vsel %vm1184_vm5, %v1059_v21, %v1208_v44  ;;  %v1198_v6 = vsel %vm1190_vm8, %v1119_v9, %v1197_v23  ;;  %v1179_v11 = vsel %vm1178_vm2, %v3655_v16, %v3631_v37  ;;  %v1507_v9 = vld [vmem:[#allocation14 + $0xe8] sm:$0xff]  ;;  %v1524_v23 = vld [vmem:[#allocation14 + $0x170] sm:$0xff] }
 0x1b2   : > { %v1111_v24 = vadd.f32 %v3997_v0, %v3692_v61  ;;  %v1210_v29 = vsel %vm1186_vm6, %v1083_v35, %v1209_v56  ;;  %v3998_v41 = vrot.slane %v3669_v15, 1  ;;  %1345 = vmatprep.mubr.f32.mxu0 %v1198_v6  ;;  %v1089_v25 = vadd.f32 %v1088_v22, %v1087_v57  ;;  %v1491_v56 = vld [vmem:[#allocation14 + $0x68] sm:$0xff]  ;;  %v1506_v0 = vld [vmem:[#allocation14 + $0xe0] sm:$0xff] }
 0x1b3   : > { %v1131_v45 = vadd.f32 %v1130_v7, %v1129_v63  ;;  %v1211_v33 = vsel %vm1188_vm7, %v1107_v36, %v1210_v29  ;;  %v1181_v61 = vsel %vm1180_vm3, %v3620_v47, %v1179_v11  ;;  %v1100_v40 = vrot.slane %v1099_v12, 1  ;;  %v1523_v22 = vld [vmem:[#allocation14 + $0x168] sm:$0xff]  ;;  %v1490_v6 = vld [vmem:[#allocation14 + $0x60] sm:$0xff] }
 0x1b4   : > { %v1077_v13 = vadd.f32 %v3998_v41, %v3669_v15  ;;  %v1112_v21 = vrot.slane %v1111_v24, 1  ;;  %v1123_v34 = vadd.f32 %v1122_v31, %v3698_v38  ;;  %v1199_v37 = vsel %vm1178_vm2, %v3659_v20, %v3635_v55  ;;  %v1538_v29 = vld [vmem:[#allocation14 + $0x1e0] sm:$0xff]  ;;  %v1489_v41 = vld [vmem:[#allocation14 + $0x58] sm:$0xff] }
 0x1b5   : > { %v1212_v16 = vsel %vm1190_vm8, %v1131_v45, %v1211_v33  ;;  %v1183_v46 = vsel %vm1182_vm4, %v3644_v8, %v1181_v61  ;;  %v1200_v57 = vsel %vm1180_vm3, %v3624_v49, %v1199_v37  ;;  %v1101_v27 = vadd.f32 %v1100_v40, %v1099_v12  ;;  %v1522_v11 = vld [vmem:[#allocation14 + $0x160] sm:$0xff]  ;;  %v1504_v45 = vld [vmem:[#allocation14 + $0xd0] sm:$0xff]  ;;  %v1521_v33 = vld [vmem:[#allocation14 + $0x158] sm:$0xff] }
 0x1b6   : > { %v1113_v15 = vadd.f32 %v1112_v21, %v1111_v24  ;;  %1420 = vmatprep.mubr.f32.mxu1 %v1212_v16  ;;  %v1185_v47 = vsel %vm1184_vm5, %v3687_v52, %v1183_v46  ;;  %v1124_v50 = vrot.slane %v1123_v34, 1  ;;  %v1201_v38 = vsel %vm1182_vm4, %v3648_v10, %v1200_v57  ;;  %v1493_v52 = vld [vmem:[#allocation14 + $0x78] sm:$0xff]  ;;  %v1536_v21 = vld [vmem:[#allocation14 + $0x1d0] sm:$0xff]  ;;  %v1503_v61 = vld [vmem:[#allocation14 + $0xc8] sm:$0xff] }
 0x1b7   : > { %v1187_v55 = vsel %vm1186_vm6, %v1065_v58, %v1185_v47  ;;  %v1202_v20 = vsel %vm1184_vm5, %v3689_v53, %v1201_v38  ;;  %v836_v31 = vrot.slane %v3704_v39, 2  ;;  %v848_v8 = vrot.slane %v3708_v26, 2  ;;  %v1539_v58 = vld [vmem:[#allocation14 + $0x1e8] sm:$0xff]  ;;  %v1520_v40 = vld [vmem:[#allocation14 + $0x150] sm:$0xff]  ;;  %v1502_v16 = vld [vmem:[#allocation14 + $0xc0] sm:$0xff] }
 0x1b8   : > { %v1189_v49 = vsel %vm1188_vm7, %v1089_v25, %v1187_v55  ;;  %v1125_v42 = vadd.f32 %v1124_v50, %v1123_v34  ;;  %v1203_v32 = vsel %vm1186_vm6, %v1077_v13, %v1202_v20  ;;  %v830_v12 = vrot.slane %v3702_v30, 2  ;;  %v1537_v13 = vld [vmem:[#allocation14 + $0x1d8] sm:$0xff]  ;;  %v1488_v25 = vld [vmem:[#allocation14 + $0x50] sm:$0xff]  ;;  %v1487_v34 = vld [vmem:[#allocation14 + $0x48] sm:$0xff] }
 0x1b9   : > { %v1191_v35 = vsel %vm1190_vm8, %v1113_v15, %v1189_v49  ;;  %v1204_v10 = vsel %vm1188_vm7, %v1101_v27, %v1203_v32  ;;  %v837_v53 = vadd.f32 %v836_v31, %v3704_v39  ;;  %v849_v51 = vadd.f32 %v848_v8, %v3708_v26  ;;  %v1535_v37 = vld [vmem:[#allocation14 + $0x1c8] sm:$0xff]  ;;  %v1486_v46 = vld [vmem:[#allocation14 + $0x40] sm:$0xff]  ;;  %v1501_v47 = vld [vmem:[#allocation14 + $0xb8] sm:$0xff] }
 0x1ba   : > { %1346 = vmatmul.mubr.f32.vlgmr.msra.gmra.mxu0 %v1191_v35  ;;  %v1205_v43 = vsel %vm1190_vm8, %v1125_v42, %v1204_v10  ;;  %v831_v62 = vadd.f32 %v830_v12, %v3702_v30  ;;  %v842_v36 = vrot.slane %v3706_v59, 2  ;;  %v1519_v15 = vld [vmem:[#allocation14 + $0x148] sm:$0xff]  ;;  %v1534_v57 = vld [vmem:[#allocation14 + $0x1c0] sm:$0xff]  ;;  %v1485_v50 = vld [vmem:[#allocation14 + $0x38] sm:$0xff] }
 0x1bb   : > { %1421 = vmatmul.mubr.f32.vlgmr.msra.gmra.mxu1 %v1205_v43  ;;  %2458 = vmatpush3.msra.mxu0 %v1493_v52  ;;  %v838_v63 = vrot.slane %v837_v53, 1  ;;  %v850_v48 = vrot.slane %v849_v51, 1  ;;  %v1518_v27 = vld [vmem:[#allocation14 + $0x140] sm:$0xff]  ;;  %v1533_v38 = vld [vmem:[#allocation14 + $0x1b8] sm:$0xff]  ;;  %v1500_v55 = vld [vmem:[#allocation14 + $0xb0] sm:$0xff] }
 0x1bc   : > { %2459 = vmatprep.subr.mxu0 %v1508_v54  ;;  %2496 = vmatpush3.msra.mxu1 %v1525_v19  ;;  %v832_v39 = vrot.slane %v831_v62, 1  ;;  %v843_v26 = vadd.f32 %v842_v36, %v3706_v59  ;;  %v1505_v59 = vld [vmem:[#allocation14 + $0xd8] sm:$0xff]  ;;  %v1484_v31 = vld [vmem:[#allocation14 + $0x30] sm:$0xff]  ;;  %v1499_v49 = vld [vmem:[#allocation14 + $0xa8] sm:$0xff] }
 0x1bd   : > { %2460 = vmatpush3.msra.mxu0 %v1492_v28  ;;  %v839_v44 = vadd.f32 %v838_v63, %v837_v53  ;;  %v851_v60 = vadd.f32 %v850_v48, %v849_v51  ;;  %2497 = vmatprep.subr.mxu1 %v1540_v14  ;;  %v1517_v20 = vld [vmem:[#allocation14 + $0x138] sm:$0xff]  ;;  %v1532_v8 = vld [vmem:[#allocation14 + $0x1b0] sm:$0xff]  ;;  %v1483_v32 = vld [vmem:[#allocation14 + $0x28] sm:$0xff] }
 0x1be   : > { %2461 = vmatprep.subr.mxu0 %v1507_v9  ;;  %v833_v30 = vadd.f32 %v832_v39, %v831_v62  ;;  %v844_v7 = vrot.slane %v843_v26, 1  ;;  %2498 = vmatpush3.msra.mxu1 %v1524_v23  ;;  %v1516_v42 = vld [vmem:[#allocation14 + $0x130] sm:$0xff]  ;;  %v1531_v52 = vld [vmem:[#allocation14 + $0x1a8] sm:$0xff]  ;;  %v1498_v12 = vld [vmem:[#allocation14 + $0xa0] sm:$0xff] }
 0x1bf   : > { %1350 = vmatprep.mubr.f32.mxu0 %v839_v44  ;;  %1425 = vmatprep.mubr.f32.mxu1 %v851_v60  ;;  %v1515_v35 = vld [vmem:[#allocation14 + $0x128] sm:$0xff]  ;;  %v1482_v10 = vld [vmem:[#allocation14 + $0x20] sm:$0xff]  ;;  %v1497_v19 = vld [vmem:[#allocation14 + $0x98] sm:$0xff] }
 0x1c0   : > { %1351 = vmatmul.mubr.f32.gmra.mxu0 %v833_v30  ;;  %v845_v24 = vadd.f32 %v844_v7, %v843_v26  ;;  %2499 = vmatprep.subr.mxu1 %v1539_v58  ;;  %v1530_v54 = vld [vmem:[#allocation14 + $0x1a0] sm:$0xff]  ;;  %v1481_v51 = vld [vmem:[#allocation14 + $0x18] sm:$0xff]  ;;  %v1496_v28 = vld [vmem:[#allocation14 + $0x90] sm:$0xff] }
 0x1c1   : > { %2462 = vmatpush3.msra.mxu0 %v1491_v56  ;;  %2500 = vmatpush3.msra.mxu1 %v1523_v22  ;;  %v1514_v53 = vld [vmem:[#allocation14 + $0x120] sm:$0xff]  ;;  %v1529_v43 = vld [vmem:[#allocation14 + $0x198] sm:$0xff]  ;;  %v1480_v62 = vld [vmem:[#allocation14 + $0x10] sm:$0xff] }
 0x1c2   : > { %1426 = vmatmul.mubr.f32.gmra.mxu1 %v845_v24  ;;  %2463 = vmatprep.subr.mxu0 %v1506_v0  ;;  %v1513_v14 = vld [vmem:[#allocation14 + $0x118] sm:$0xff]  ;;  %v1528_v36 = vld [vmem:[#allocation14 + $0x190] sm:$0xff]  ;;  %v1495_v63 = vld [vmem:[#allocation14 + $0x88] sm:$0xff] }
 0x1c3   : > { %2464 = vmatpush3.msra.mxu0 %v1490_v6  ;;  %2501 = vmatprep.subr.mxu1 %v1538_v29  ;;  %v1512_v48 = vld [vmem:[#allocation14 + $0x110] sm:$0xff]  ;;  %v1479_v9 = vld [vmem:[#allocation14 + $0x8] sm:$0xff]  ;;  %v1494_v39 = vld [vmem:[#allocation14 + $0x80] sm:$0xff] }
 0x1c4   : > { %2465 = vmatprep.subr.mxu0 %v1505_v59  ;;  %2502 = vmatpush3.msra.mxu1 %v1522_v11  ;;  %v1527_v23 = vld [vmem:[#allocation14 + $0x188] sm:$0xff]  ;;  %v1478_v44 = vld [vmem:[#allocation14] sm:$0xff]  ;;  %v3786_v7 = vld [vmem:[%s3530_s13] sm:$0x3f]  ;;  %s4006_s13 = sld [smem:[#allocation34_spill]] }
 0x1c5   : > { %2466 = vmatpush3.msra.mxu0 %v1489_v41  ;;  %2503 = vmatprep.subr.mxu1 %v1537_v13  ;;  %v809_v26 = vld [vmem:[%s3537_s19 + $0x8] sm:$0xff]  ;;  %v808_v58 = vld [vmem:[%s3537_s19] sm:$0xff]  ;;  %v811_v0 = vld [vmem:[%s3537_s19 + $0x18] sm:$0xff]  ;;  %v1455_v59 = vrot.slane %v3786_v7, %v3560_v5  ;;  %v1451_v41 = vrot.slane %v3786_v7, %v3554_v3 }
 0x1c6   : > { %2467 = vmatprep.subr.mxu0 %v1504_v45  ;;  %2504 = vmatpush3.msra.mxu1 %v1521_v33  ;;  %v1511_v60 = vld [vmem:[#allocation14 + $0x108] sm:$0xff]  ;;  %v1526_v30 = vld [vmem:[#allocation14 + $0x180] sm:$0xff]  ;;  %v1573_v56 = vld [vmem:[#allocation14 + $0x2f8] sm:$0xff]  ;;  %v1463_v45 = vrot.slane %v3786_v7, %v3557_v4 }
 0x1c7   : > { %2468 = vmatpush3.msra.mxu0 %v1488_v25  ;;  %2505 = vmatprep.subr.mxu1 %v1536_v21  ;;  %v1510_v22 = vld [vmem:[#allocation14 + $0x100] sm:$0xff]  ;;  %v1557_v24 = vld [vmem:[#allocation14 + $0x278] sm:$0xff]  ;;  %v1572_v29 = vld [vmem:[#allocation14 + $0x2f0] sm:$0xff]  ;;  %v1459_v25 = vrot.slane %v3786_v7, %v3551_v2 }
 0x1c8   : > { %2469 = vmatprep.subr.mxu0 %v1503_v61  ;;  %2506 = vmatpush3.msra.mxu1 %v1520_v40  ;;  %v810_v6 = vld [vmem:[%s3537_s19 + $0x10] sm:$0xff]  ;;  %v1571_v13 = vld [vmem:[#allocation14 + $0x2e8] sm:$0xff] }
 0x1c9   : > { %2470 = vmatpush3.msra.mxu0 %v1487_v34  ;;  %2507 = vmatprep.subr.mxu1 %v1535_v37  ;;  %v1556_v11 = vld [vmem:[#allocation14 + $0x270] sm:$0xff]  ;;  %v1555_v33 = vld [vmem:[#allocation14 + $0x268] sm:$0xff]  ;;  %v1570_v21 = vld [vmem:[#allocation14 + $0x2e0] sm:$0xff] }
 0x1ca   : > { %2471 = vmatprep.subr.mxu0 %v1502_v16  ;;  %2508 = vmatpush3.msra.mxu1 %v1519_v15  ;;  %v1554_v61 = vld [vmem:[#allocation14 + $0x260] sm:$0xff]  ;;  %v813_v40 = vld [vmem:[%s3537_s19 + $0x28] sm:$0xff]  ;;  %v1568_v16 = vld [vmem:[#allocation14 + $0x2d0] sm:$0xff]  ;;  %s770_s30 = scalar_lea.vmem %s4006_s13, %s3582_s17  ;;  %s2376_s17 = sshll.u32 %s3259_s15, 4 }
 0x1cb   : > { %2472 = vmatpush3.msra.mxu0 %v1486_v46  ;;  %2509 = vmatprep.subr.mxu1 %v1534_v57  ;;  %v1569_v34 = vld [vmem:[#allocation14 + $0x2d8] sm:$0xff]  ;;  %v1552_v15 = vld [vmem:[#allocation14 + $0x250] sm:$0xff]  ;;  %v3145_v46 = vmov 0.0   ;;  %v1567_v57 = vld [vmem:[#allocation14 + $0x2c8] sm:$0xff] }
 0x1cc   : > { %2473 = vmatprep.subr.mxu0 %v1501_v47  ;;  %2510 = vmatpush3.msra.mxu1 %v1518_v27  ;;  %v1553_v37 = vld [vmem:[#allocation14 + $0x258] sm:$0xff]  ;;  %v1551_v47 = vld [vmem:[#allocation14 + $0x248] sm:$0xff]  ;;  %v1566_v27 = vld [vmem:[#allocation14 + $0x2c0] sm:$0xff] }
 0x1cd   : > { %2474 = vmatpush3.msra.mxu0 %v1485_v50  ;;  %2511 = vmatprep.subr.mxu1 %v1533_v38  ;;  %v1550_v50 = vld [vmem:[#allocation14 + $0x240] sm:$0xff]  ;;  %v1565_v38 = vld [vmem:[#allocation14 + $0x2b8] sm:$0xff] }
 0x1ce   : > { %2475 = vmatprep.subr.mxu0 %v1500_v55  ;;  %2512 = vmatpush3.msra.mxu1 %v1517_v20  ;;  %v1549_v55 = vld [vmem:[#allocation14 + $0x238] sm:$0xff]  ;;  %v1564_v20 = vld [vmem:[#allocation14 + $0x2b0] sm:$0xff] }
 0x1cf   : > { %2476 = vmatpush3.msra.mxu0 %v1484_v31  ;;  %2513 = vmatprep.subr.mxu1 %v1532_v8  ;;  %v1548_v31 = vld [vmem:[#allocation14 + $0x230] sm:$0xff]  ;;  %v1563_v8 = vld [vmem:[#allocation14 + $0x2a8] sm:$0xff] }
 0x1d0   : > { %2477 = vmatprep.subr.mxu0 %v1499_v49  ;;  %2514 = vmatpush3.msra.mxu1 %v1516_v42  ;;  %v1547_v49 = vld [vmem:[#allocation14 + $0x228] sm:$0xff]  ;;  %v1562_v42 = vld [vmem:[#allocation14 + $0x2a0] sm:$0xff] }
 0x1d1   : > { %2478 = vmatpush3.msra.mxu0 %v1483_v32  ;;  %2515 = vmatprep.subr.mxu1 %v1531_v52  ;;  %v1546_v32 = vld [vmem:[#allocation14 + $0x220] sm:$0xff]  ;;  %v1561_v52 = vld [vmem:[#allocation14 + $0x298] sm:$0xff] }
 0x1d2   : > { %2479 = vmatprep.subr.mxu0 %v1498_v12  ;;  %2516 = vmatpush3.msra.mxu1 %v1515_v35  ;;  %v1545_v12 = vld [vmem:[#allocation14 + $0x218] sm:$0xff]  ;;  %v1560_v35 = vld [vmem:[#allocation14 + $0x290] sm:$0xff] }
 0x1d3   : > { %2480 = vmatpush3.msra.mxu0 %v1482_v10  ;;  %2517 = vmatprep.subr.mxu1 %v1530_v54  ;;  %v1544_v10 = vld [vmem:[#allocation14 + $0x210] sm:$0xff]  ;;  %v1559_v54 = vld [vmem:[#allocation14 + $0x288] sm:$0xff] }
 0x1d4   : > { %2481 = vmatprep.subr.mxu0 %v1497_v19  ;;  %2518 = vmatpush3.msra.mxu1 %v1514_v53  ;;  %v1543_v19 = vld [vmem:[#allocation14 + $0x208] sm:$0xff]  ;;  %v1558_v53 = vld [vmem:[#allocation14 + $0x280] sm:$0xff] }
 0x1d5   : > { %2482 = vmatpush3.msra.mxu0 %v1481_v51  ;;  %2519 = vmatprep.subr.mxu1 %v1529_v43  ;;  %v1542_v51 = vld [vmem:[#allocation14 + $0x200] sm:$0xff] }
 0x1d6   : > { %2483 = vmatprep.subr.mxu0 %v1496_v28  ;;  %2520 = vmatpush3.msra.mxu1 %v1513_v14  ;;  %v812_v43 = vld [vmem:[%s3537_s19 + $0x20] sm:$0xff]  ;;  %v1471_v28 = vrot.slane %v3786_v7, %v3574_v17  ;;  %v1826_v14 = vld [vmem:[#allocation15 + $0x78] sm:$0xff]  ;;  %s4007_s19 = sld [smem:[#allocation29_spill]] }
 0x1d7   : > { %2484 = vmatpush3.msra.mxu0 %v1480_v62  ;;  %2521 = vmatprep.subr.mxu1 %v1528_v36  ;;  %v1467_v62 = vrot.slane %v3786_v7, %v3577_v18  ;;  %v1825_v36 = vld [vmem:[#allocation15 + $0x70] sm:$0xff]  ;;  %v1814_v7 = vld [vmem:[#allocation15 + $0x18] sm:$0xff] }
 0x1d8   : > { %2485 = vmatprep.subr.mxu0 %v1495_v63  ;;  %2522 = vmatpush3.msra.mxu1 %v1512_v48  ;;  %v1824_v63 = vld [vmem:[#allocation15 + $0x68] sm:$0xff]  ;;  %v1823_v48 = vld [vmem:[#allocation15 + $0x60] sm:$0xff] }
 0x1d9   : > { %2486 = vmatpush3.msra.mxu0 %v1479_v9  ;;  %2523 = vmatprep.subr.mxu1 %v1527_v23  ;;  %v1822_v9 = vld [vmem:[#allocation15 + $0x58] sm:$0xff]  ;;  %v1821_v23 = vld [vmem:[#allocation15 + $0x50] sm:$0xff] }
 0x1da   : > { %2487 = vmatprep.subr.mxu0 %v1494_v39  ;;  %1645 = vmatprep.mubr.f32.mxu0 %v809_v26  ;;  %v1820_v39 = vld [vmem:[#allocation15 + $0x48] sm:$0xff]  ;;  %v1819_v26 = vld [vmem:[#allocation15 + $0x40] sm:$0xff] }
 0x1db   : > { %2488 = vmatpush3.msra.mxu0 %v1478_v44  ;;  %2524 = vmatpush3.msra.mxu1 %v1511_v60  ;;  %v1818_v44 = vld [vmem:[#allocation15 + $0x38] sm:$0xff]  ;;  %v1817_v60 = vld [vmem:[#allocation15 + $0x30] sm:$0xff] }
 0x1dc   : > { %1646 = vmatmul.mubr.f32.vlgmr.msra.gmra.mxu0 %v808_v58  ;;  %2525 = vmatprep.subr.mxu1 %v1526_v30  ;;  %v1816_v58 = vld [vmem:[#allocation15 + $0x28] sm:$0xff]  ;;  %v1815_v30 = vld [vmem:[#allocation15 + $0x20] sm:$0xff]  ;;  %p4009_p8 = scmp.ne.s32.totalorder %s4007_s19, 0 }
 0x1dd   : > { %2533 = vmatprep.subr.mxu0 %v1573_v56  ;;  %2526 = vmatpush3.msra.mxu1 %v1510_v22  ;;  %v1813_v56 = vld [vmem:[#allocation15 + $0x10] sm:$0xff]  ;;  %v1812_v22 = vld [vmem:[#allocation15 + $0x8] sm:$0xff] }
 0x1de   : > { %1720 = vmatprep.mubr.f32.mxu1 %v811_v0  ;;  %2534 = vmatpush3.msra.mxu0 %v1557_v24  ;;  %v1811_v0 = vld [vmem:[#allocation15] sm:$0xff]  ;;  %v1842_v24 = vld [vmem:[#allocation17 + $0x78] sm:$0xff]  ;;  %p3052_p9 = pnand %p3051_p12, %p4009_p8 }
 0x1df   : > { %1721 = vmatmul.mubr.f32.vlgmr.msra.gmra.mxu1 %v810_v6  ;;  %2535 = vmatprep.subr.mxu0 %v1572_v29  ;;  %v1841_v6 = vld [vmem:[#allocation17 + $0x70] sm:$0xff]  ;;  %v1840_v29 = vld [vmem:[#allocation17 + $0x68] sm:$0xff] }
 0x1e0   : > { %2536 = vmatpush3.msra.mxu0 %v1556_v11  ;;  %1650 = vmatprep.mubr.f32.mxu0 %v1455_v59  ;;  %v1839_v59 = vld [vmem:[#allocation17 + $0x60] sm:$0xff]  ;;  %v1838_v11 = vld [vmem:[#allocation17 + $0x58] sm:$0xff]  ;;  %p3053_p2 = pneg %p3052_p9 }
 0x1e1   : > { %2537 = vmatprep.subr.mxu0 %v1571_v13  ;;  %1651 = vmatmul.mubr.f32.gmra.mxu0 %v1451_v41  ;;  %v1837_v41 = vld [vmem:[#allocation17 + $0x50] sm:$0xff]  ;;  %v1836_v13 = vld [vmem:[#allocation17 + $0x48] sm:$0xff] }
 0x1e2   : > { %2538 = vmatpush3.msra.mxu0 %v1555_v33  ;;  %1725 = vmatprep.mubr.f32.mxu1 %v1463_v45  ;;  %v1835_v45 = vld [vmem:[#allocation17 + $0x40] sm:$0xff]  ;;  %v1834_v33 = vld [vmem:[#allocation17 + $0x38] sm:$0xff] }
 0x1e3   : > { %2539 = vmatprep.subr.mxu0 %v1570_v21  ;;  %1726 = vmatmul.mubr.f32.gmra.mxu1 %v1459_v25  ;;  %v1833_v25 = vld [vmem:[#allocation17 + $0x30] sm:$0xff]  ;;  %v1832_v21 = vld [vmem:[#allocation17 + $0x28] sm:$0xff] }
 0x1e4   : > { %2540 = vmatpush3.msra.mxu0 %v1554_v61  ;;  %1795 = vmatprep.mubr.f32.mxu0 %v813_v40  ;;  %v1831_v61 = vld [vmem:[#allocation17 + $0x20] sm:$0xff]  ;;  %v1830_v40 = vld [vmem:[#allocation17 + $0x18] sm:$0xff] }
 0x1e5   : > { %2541 = vmatprep.subr.mxu0 %v1569_v34  ;;  %2605 = vmatprep.subr.mxu1 %v3145_v46  ;;  %v1829_v34 = vld [vmem:[#allocation17 + $0x10] sm:$0xff] }
 0x1e6   : > { %2542 = vmatpush3.msra.mxu0 %v1553_v37  ;;  %2637 = vmatprep.mubr.msk.f32.mxu1 %vm3146_vm9, %v3145_v46  ;;  %v1828_v37 = vld [vmem:[#allocation17 + $0x8] sm:$0xff] }
 0x1e7   : > { %2543 = vmatprep.subr.mxu0 %v1568_v16  ;;  %2606 = vmatpush3.msra.mxu1 %v1842_v24  ;;  %v1827_v16 = vld [vmem:[#allocation17] sm:$0xff] }
 0x1e8   : > { %2544 = vmatpush3.msra.mxu0 %v1552_v15  ;;  %2607 = vmatprep.subr.mxu1 %v3145_v46  ;;  %v1142_v15 = vpop.xlane.xlu0 %1141 }
 0x1e9   : > { %2545 = vmatprep.subr.mxu0 %v1567_v57  ;;  %2608 = vmatpush3.msra.mxu1 %v1841_v6  ;;  %v1135_v57 = vpop.xlane.xlu1 %1134 }
 0x1ea   : > { %2546 = vmatpush3.msra.mxu0 %v1551_v47  ;;  %2609 = vmatprep.subr.mxu1 %v3145_v46  ;;  %v1143_v47 = vmax.f32 %v1142_v15, 1.0 }
 0x1eb   : > { %2547 = vmatprep.subr.mxu0 %v1566_v27  ;;  %2610 = vmatpush3.msra.mxu1 %v1840_v29  ;;  %v1136_v27 = vmax.f32 %v1135_v57, 1.0  ;;  %v2374_v57 = vld [vmem:[%s4001_s20] ss:$0 sm:$0xff] }
 0x1ec   : > { %2548 = vmatpush3.msra.mxu0 %v1550_v50  ;;  %2611 = vmatprep.subr.mxu1 %v3145_v46  ;;  %2798 = vrcp.f32 %v1143_v47 }
 0x1ed   : > { %2549 = vmatprep.subr.mxu0 %v1565_v38  ;;  %2612 = vmatpush3.msra.mxu1 %v1839_v59  ;;  %2800 = vrcp.f32 %v1136_v27 }
 0x1ee   : > { %2550 = vmatpush3.msra.mxu0 %v1549_v55  ;;  %2613 = vmatprep.subr.mxu1 %v3145_v46 }
 0x1ef   : > { %2551 = vmatprep.subr.mxu0 %v1564_v20  ;;  %2614 = vmatpush3.msra.mxu1 %v1838_v11 }
 0x1f0   : > { %2552 = vmatpush3.msra.mxu0 %v1548_v31  ;;  %2615 = vmatprep.subr.mxu1 %v3145_v46 }
 0x1f1   : > { %2553 = vmatprep.subr.mxu0 %v1563_v8  ;;  %2616 = vmatpush3.msra.mxu1 %v1837_v41 }
 0x1f2   : > { %2554 = vmatpush3.msra.mxu0 %v1547_v49  ;;  %2617 = vmatprep.subr.mxu1 %v3145_v46 }
 0x1f3   : > { %2555 = vmatprep.subr.mxu0 %v1562_v42  ;;  %2618 = vmatpush3.msra.mxu1 %v1836_v13 }
 0x1f4   : > { %2556 = vmatpush3.msra.mxu0 %v1546_v32  ;;  %2619 = vmatprep.subr.mxu1 %v3145_v46 }
 0x1f5   : > { %2557 = vmatprep.subr.mxu0 %v1561_v52  ;;  %2620 = vmatpush3.msra.mxu1 %v1835_v45 }
 0x1f6   : > { %2558 = vmatpush3.msra.mxu0 %v1545_v12  ;;  %2621 = vmatprep.subr.mxu1 %v3145_v46 }
 0x1f7   : > { %2559 = vmatprep.subr.mxu0 %v1560_v35  ;;  %2622 = vmatpush3.msra.mxu1 %v1834_v33 }
 0x1f8   : > { %2560 = vmatpush3.msra.mxu0 %v1544_v10  ;;  %2623 = vmatprep.subr.mxu1 %v3145_v46 }
 0x1f9   : > { %2561 = vmatprep.subr.mxu0 %v1559_v54  ;;  %2624 = vmatpush3.msra.mxu1 %v1833_v25  ;;  %v2799_v35 = vpop.eup %2798 }
 0x1fa   : > { %2562 = vmatpush3.msra.mxu0 %v1543_v19  ;;  %2625 = vmatprep.subr.mxu1 %v3145_v46  ;;  %v2801_v54 = vpop.eup %2800  ;;  %v1432_v19 = vld [vmem:[%s3999_s7] sm:$0x1]  ;;  %s2138_s7 = scalar_lea.hbm %s4008_s11, %s2376_s17 }
 0x1fb   : > { %2563 = vmatprep.subr.mxu0 %v1558_v53  ;;  %2626 = vmatpush3.msra.mxu1 %v1832_v21 }
 0x1fc   : > { %2564 = vmatpush3.msra.mxu0 %v1542_v51  ;;  %2627 = vmatprep.subr.mxu1 %v3145_v46 }
 0x1fd   : > { %1796 = vmatmul.mubr.f32.vlgmr.msra.gmra.mxu0 %v812_v43  ;;  %2640 = vmatprep.subr.mxu0 %v3145_v46  ;;  %v1437_v43 = vrot.slane %v1432_v19, %v3554_v3 }
 0x1fe   : > { %1800 = vmatprep.mubr.f32.mxu0 %v1471_v28  ;;  %2641 = vmatpush3.msra.mxu0 %v1826_v14 }
 0x1ff   : > { %2642 = vmatprep.subr.mxu0 %v3145_v46  ;;  %2628 = vmatpush3.msra.mxu1 %v1831_v61 }
 0x200   : > { %2643 = vmatpush3.msra.mxu0 %v1825_v36  ;;  %2629 = vmatprep.subr.mxu1 %v3145_v46 }
 0x201   : > { %1801 = vmatmul.mubr.f32.gmra.mxu0 %v1467_v62  ;;  %2644 = vmatprep.subr.mxu0 %v3145_v46 }
 0x202   : > { %2645 = vmatpush3.msra.mxu0 %v1824_v63  ;;  %2672 = vmatprep.mubr.msk.f32.mxu0 %vm3146_vm9, %v3145_v46 }
 0x203   : > { %2646 = vmatprep.subr.mxu0 %v3145_v46  ;;  %2630 = vmatpush3.msra.mxu1 %v1830_v40 }
 0x204   : > { %2647 = vmatpush3.msra.mxu0 %v1823_v48  ;;  %2631 = vmatprep.subr.mxu1 %v3145_v46 }
 0x205   : > { %2648 = vmatprep.subr.mxu0 %v3145_v46  ;;  %2632 = vmatpush3.msra.mxu1 %v1829_v34 }
 0x206   : > { %2649 = vmatpush3.msra.mxu0 %v1822_v9  ;;  %2633 = vmatprep.subr.mxu1 %v3145_v46 }
 0x207   : > { %2650 = vmatprep.subr.mxu0 %v3145_v46  ;;  %2634 = vmatpush3.msra.mxu1 %v1828_v37 }
 0x208   : > { %2651 = vmatpush3.msra.mxu0 %v1821_v23  ;;  %2635 = vmatprep.subr.mxu1 %v3145_v46 }
 0x209   : > { %2652 = vmatprep.subr.mxu0 %v3145_v46  ;;  %2636 = vmatpush3.msra.mxu1 %v1827_v16 }
 0x20a   : > { %2653 = vmatpush3.msra.mxu0 %v1820_v39 }
 0x20b   : > { %2654 = vmatprep.subr.mxu0 %v3145_v46 }
 0x20c   : > { %2655 = vmatpush3.msra.mxu0 %v1819_v26 }
 0x20d   : > { %2656 = vmatprep.subr.mxu0 %v3145_v46 }
 0x20e   : > { %2657 = vmatpush3.msra.mxu0 %v1818_v44 }
 0x20f   : > { %2658 = vmatprep.subr.mxu0 %v3145_v46 }
 0x210   : > { %2659 = vmatpush3.msra.mxu0 %v1817_v60 }
 0x211   : > { %2660 = vmatprep.subr.mxu0 %v3145_v46 }
 0x212   : > { %2661 = vmatpush3.msra.mxu0 %v1816_v58 }
 0x213   : > { %2662 = vmatprep.subr.mxu0 %v3145_v46 }
 0x214   : > { %2663 = vmatpush3.msra.mxu0 %v1815_v30 }
 0x215   : > { %2664 = vmatprep.subr.mxu0 %v3145_v46 }
 0x216   : > { %2665 = vmatpush3.msra.mxu0 %v1814_v7 }
 0x217   : > { %2666 = vmatprep.subr.mxu0 %v3145_v46 }
 0x218   : > { %2667 = vmatpush3.msra.mxu0 %v1813_v56 }
 0x219   : > { %2668 = vmatprep.subr.mxu0 %v3145_v46 }
 0x21a   : > { %2669 = vmatpush3.msra.mxu0 %v1812_v22  ;;  %v2373_v22 = vld [vmem:[%s4000_s4] ss:$0 sm:$0xff]  ;;  %s3149_s4 = smov [#allocation18]  }
 0x21b   : > { %2670 = vmatprep.subr.mxu0 %v3145_v46  ;;  %s3054_s9 = sshll.u32 %s3149_s4, 4  ;;  %s3055_s9 = int_to_ptr.vmem [resolvable:$false] %s3054_s9 }
 0x21c   : > { %2671 = vmatpush3.msra.mxu0 %v1811_v0  ;;  %s3056_s15 = scalar_lea.vmem %s3055_s9, 32  ;;  %p3057_p1 = scmp.lt.s32.totalorder %s2141_s23, %s3055_s9 }
 0x21d   : > { %p3058_p3 = scmp.lt.s32.totalorder %s3056_s15, %s3050_s18 }
 0x21f   : > { %p3059_p5 = por %p3058_p3, %p3057_p1 }
 0x221   : > { %p3060_p6 = pnand %p3059_p5, %p3053_p2 }
 0x27a   : > { %v2413_v50 = vpop.f32.mrf.mxu0 }
 0x27b   : > { %v2451_v38 = vpop.f32.mrf.mxu1 }
 0x27c   : > { %v2414_v55 = vpop.f32.mrf.mxu0 }
 0x27d   : > { %v2452_v20 = vpop.f32.mrf.mxu1  ;;  %v2415_v8 = vadd.f32 %v2414_v55, %v2413_v50 }
 0x27e   : > { %v2453_v49 = vadd.f32 %v2452_v20, %v2451_v38  ;;  %v2375_v38 = vld [vmem:[%s4002_s22] ss:$0 sm:$0xff] }
 0x280   : > { %v2416_v31 = vpop.f32.mrf.mxu0  ;;  %v1423_v46 = vadd.f32 %v2453_v49, %v2415_v8  ;;  %v3148_v8 = vmov 1966171168  }
 0x281   : > { %v2044_v49 = vunpack.c.l.s4 %v3148_v8 }
 0x282   : > { %v2454_v42 = vpop.f32.mrf.mxu1  ;;  %v2417_v32 = vpop.f32.mrf.mxu0  ;;  %v1431_v51 = vmul.f32 %v2799_v35, %v1423_v46 }
 0x283   : > { %v2418_v52 = vadd.f32 %v2417_v32, %v2416_v31  ;;  %v3147_v31 = vmov 0   ;;  %v2045_v32 = vunpack.c.0.s8 %v2044_v49 }
 0x284   : > { %v2455_v12 = vpop.f32.mrf.mxu1  ;;  %v1439_v62 = vadd.f32 %v1437_v43, %v1431_v51  ;;  %2796 = vset.pattern.permute.xlu1 %v3147_v31  ;;  %2797 = vset.pattern.permute.xlu0 %v3147_v31  ;;  %v4003_v43 = vsub.s32 6, %v3548_v1 }
 0x285   : > { %v2456_v10 = vadd.f32 %v2455_v12, %v2454_v42  ;;  %v2003_v42 = vstv %s2002_s27  ;;  %v2048_v35 = vsub.s32 %v2045_v32, %v3548_v1 }
 0x287   : > { %v1428_v53 = vadd.f32 %v2456_v10, %v2418_v52 }
 0x289   : > { %v1440_v28 = vmul.f32 %v2801_v54, %v1428_v53 }
 0x28b   : > { %v1441_v14 = vadd.f32 %v1440_v28, %v1432_v19 }
 0x28d   : > { %v1445_v36 = vrot.slane %v1441_v14, %v3554_v3  ;;  %v4004_v14 = vsub.s32 7, %v3548_v1 }
 0x28f   : > { %v1446_v63 = vmul.f32 %v1445_v36, %v1439_v62 }
 0x291   : > { %2673 = vmatmul.mubr.f32.vlgmr.msra.gmra.mxu0 %v1446_v63 }
 0x29c   : > { %v2489_v48 = vpop.f32.mrf.mxu0 }
 0x29e   : > { %v2490_v9 = vpop.f32.mrf.mxu0 }
 0x29f   : > { %v2527_v23 = vpop.f32.mrf.mxu1  ;;  %v2491_v56 = vadd.f32 %v2490_v9, %v2489_v48 }
 0x2a1   : > { %v2492_v39 = vpop.f32.mrf.mxu0  ;;  %v2528_v26 = vpop.f32.mrf.mxu1  ;;  %v1648_v59 = vadd.f32 %v2491_v56, %v2373_v22  ;;  %v816_v56 = vld [vmem:[%s770_s30] sm:$0x1] }
 0x2a2   : > { %v2529_v11 = vadd.f32 %v2528_v26, %v2527_v23  ;;  %vm2005_vm10 = vcmp.gt.f32.partialorder %v816_v56, 0.0 }
 0x2a3   : > { %v2493_v44 = vpop.f32.mrf.mxu0  ;;  %v2530_v60 = vpop.f32.mrf.mxu1 }
 0x2a4   : > { %v2494_v58 = vadd.f32 %v2493_v44, %v2492_v39  ;;  %v1723_v25 = vadd.f32 %v2529_v11, %v1648_v59  ;;  %v4005_v44 = vlaneseq }
 0x2a5   : > { %v2531_v30 = vpop.f32.mrf.mxu1 }
 0x2a6   : > { %v1653_v24 = vadd.f32 %v2494_v58, %v2373_v22  ;;  %v2532_v6 = vadd.f32 %v2531_v30, %v2530_v60  ;;  %v2092_v60 = vand.u32 127, %v4005_v44 }
 0x2a8   : > { %v1728_v13 = vadd.f32 %v2532_v6, %v1653_v24  ;;  %v2095_v58 = vsub.s32 %v2092_v60, %v3548_v1 }
 0x2bd   : > { %v2565_v7 = vpop.f32.mrf.mxu0 }
 0x2bf   : > { %v2566_v0 = vpop.f32.mrf.mxu0 }
 0x2c0   : > { %v2567_v45 = vadd.f32 %v2566_v0, %v2565_v7 }
 0x2c1   : > { %v2568_v29 = vpop.f32.mrf.mxu0 }
 0x2c2   : > { %v1798_v61 = vadd.f32 %v2567_v45, %v1723_v25 }
 0x2c3   : > { %v2569_v41 = vpop.f32.mrf.mxu0 }
 0x2c4   : > { %v2570_v33 = vadd.f32 %v2569_v41, %v2568_v29 }
 0x2c6   : > { %v1803_v21 = vadd.f32 %v2570_v33, %v1728_v13 }
 0x2c8   : > { %v1809_v40 = vrot.slane %v1803_v21, %v3554_v3 }
 0x2ca   : > { %v1810_v34 = vmul.f32 %v1809_v40, %v1798_v61 }
 0x2cc   : > { %2638 = vmatmul.mubr.f32.vlgmr.msra.gmra.mxu1 %v1810_v34 }
 0x351   : > { %v1979_v37 = vpop.f32.mrf.mxu0 }
 0x353   : > { %v2674_v16 = vpop.f32.mrf.mxu0 }
 0x38c   : > { %v1909_v15 = vpop.f32.mrf.mxu1 }
 0x38d   : > { %v1980_v47 = vadd.f32 %v1979_v37, %v1909_v15 }
 0x38e   : > { %v2639_v27 = vpop.f32.mrf.mxu1 }
 0x38f   : > { %v1990_v50 = vadd.f32 %v2374_v57, %v1980_v47 }
 0x391   : > { %v1991_v55 = vmax.f32 %v1990_v50, 0.0 }
 0x393   : > { %v1999_v20 = vmul.f32 %v2375_v38, %v1991_v55 }
 0x395   : > { %2000 = vadd.xlane.f32.xlu0 %v1999_v20 }
 0x41e   : > { %v2001_v52 = vpop.xlane.xlu0 %2000 }
 0x41f   : > { %v2004_v12 = vadd.f32 %v2003_v42, %v2001_v52 }
 0x421   : > { %v2010_v46 = vrot.slane %v2004_v12, %v3554_v3  ;;  %v2014_v10 = vrot.slane %v2004_v12, %v3560_v5  ;;  %v2018_v54 = vrot.slane %v2004_v12, %v3551_v2  ;;  %v2022_v19 = vrot.slane %v2004_v12, %v3557_v4 }
 0x422   : > { %v2026_v53 = vrot.slane %v2004_v12, %v3577_v18  ;;  %v2030_v51 = vrot.slane %v2004_v12, %v3574_v17  ;;  %v2034_v28 = vrot.slane %v2004_v12, %v4003_v43  ;;  %v2038_v62 = vrot.slane %v2004_v12, %v4004_v14 }
 0x423   : > { %v2039_v36 = vcombine.low %v2010_v46, %v2014_v10  ;;  %v2040_v63 = vcombine.low %v2018_v54, %v2022_v19 }
 0x424   : > { %v2041_v3 = vcombine.low %v2026_v53, %v2030_v51  ;;  %v2042_v48 = vcombine.low %v2034_v28, %v2038_v62 }
 0x425   : > { %v2049_v5 = vrot.slane %v2039_v36, %v2048_v35  ;;  %v2056_v9 = vrot.slane %v2040_v63, %v2048_v35 }
 0x426   : > { %v2063_v2 = vrot.slane %v2041_v3, %v2048_v35  ;;  %v2070_v23 = vrot.slane %v2042_v48, %v2048_v35 }
 0x427   : > { %v2071_v4 = vcombine.low %v2049_v5, %v2056_v9 }
 0x428   : > { %v2072_v39 = vcombine.low %v2063_v2, %v2070_v23 }
 0x429   : > { %v2079_v18 = vrot.slane %v2071_v4, %v2048_v35 }
 0x42a   : > { %v2086_v26 = vrot.slane %v2072_v39, %v2048_v35 }
 0x42c   : > { %v2087_v17 = vcombine.low %v2079_v18, %v2086_v26 }
 0x42e   : > { %2089 = vperm.xlu1 %2796, %v2087_v17  }
 0x4a9   : > { %v2090_v30 = vpop.permute.xlu1 %2089 }
 0x4aa   : > { %v2096_v7 = vrot.slane %v2090_v30, %v2095_v58 }
 0x4ac   : > { %v2103_v22 = vrot.slane %v2096_v7, %v2048_v35 }
 0x4ae   : > { %v2110_v0 = vrot.slane %v2103_v22, %v2048_v35 }
 0x4b0   : > { %v2112_v24 = vsel %vm2005_vm10, %v2110_v0, -1e+30 }
 0x4b1   : > { %v2113_v6 = vsel %vm1132_vm1, %v2112_v24, -inf }
 0x4b2   : > { %2114 = vmax.xlane.f32.xlu0 %v2113_v6 }
 0x53b   : > { %v2115_v29 = vpop.xlane.xlu0 %2114 }
 0x53c   : > { %v2116_v59 = vsub.f32 %v2112_v24, %v2115_v29 }
 0x53e   : > { %v2117_v11 = vmul.f32 1.442695, %v2116_v59 }
 0x540   : > { %2802 = vpow2.f32 %v2117_v11 }
 0x54d   : > { %v2803_v1 = vpop.eup %2802 }
 0x54e   : > { %v2119_v41 = vmul.f32 %v2803_v1, %v816_v56 }
 0x550   : > { %v2120_v13 = vsel %vm1132_vm1, %v2119_v41, 0.0 }
 0x551   : > { %2121 = vadd.xlane.f32.xlu0 %v2120_v13 }
 0x5da   : > { %v2122_v45 = vpop.xlane.xlu0 %2121 }
 0x5db   : > { %v2123_v33 = vmax.f32 %v2122_v45, 1e-30 }
 0x5dd   : > { %2804 = vrcp.f32 %v2123_v33 }
 0x5ea   : > { %v2805_v25 = vpop.eup %2804 }
 0x5eb   : > { %v2125_v21 = vmul.f32 %v2805_v25, %v2119_v41 }
 0x5ed   : > { %2126 = vst.msk [vmem:[%s764_s0] sm:$0x1] %vm1132_vm1, %v2125_v21 }
 0x5ee   : > { %3063 = shalt.err (!%p3060_p6)
}
 0x5ef   : > { %s3064_s8 = scalar_lea.hbm %s2138_s7, 16  ;;  %s3068_s16 = scalar_lea.hbm %s4008_s11, 32 }
 0x5f0   : > { %p3065_p4 = scmp.ne.s32.totalorder %s2138_s7, %s3064_s8  ;;  %p3069_p7 = scmp.lt.s32.totalorder %s2138_s7, %s4008_s11 }
 0x5f1   : > { %p3070_p10 = scmp.lt.s32.totalorder %s3068_s16, %s3064_s8 }
 0x5f2   : > { %p3066_p0 = pnand %p3065_p4, %p4009_p8 }
 0x5f3   : > { %p3071_p13 = por %p3070_p10, %p3069_p7 }
 0x5f4   : > { %p3067_p11 = pneg %p3066_p0 }
 0x5f6   : > { %p3072_p12 = pnand %p3071_p13, %p3067_p11 }
 0x5f8   : > { %3075 = shalt.err (!%p3072_p12)
}
 0x5f9   : > { %2707 = dma.vmem_to_hbm [thread:$0]  (%p4009_p8), %s2141_s23, 16, %s2138_s7, %s2128_s14  }
 0x5fa PF: > { %s4010_s27 = sld [smem:[#allocation25_spill]]  ;;  %p4013_p2 = scmp.ge.s32.totalorder %s3130_s26, 2 }
 0x5fb   : > { %s4011_s21 = sld [smem:[#allocation30_spill]] }
 0x600   : > { %s2152_s28 = sand.u32 1, %s4010_s27  }
 0x601   : > { %p4012_p9 = scmp.ne.s32.totalorder %s4011_s21, 0  ;;  %s2153_s13 = scalar_lea.sflag [#allocation5], %s2152_s28 }
 0x603   : > { %p2739_p1 = pnand %p4013_p2, %p4012_p9 }
 0x605   : > { %p2740_p3 = pneg %p2739_p1 }
 0x607   : > { %3113 = dma.done.wait (%p2740_p3), %s2153_s13, 16  }
 0x608   : > { %3115 = vsyncadd (%p2740_p3), %s2153_s13, 4294967280  ;;  %s4014_s26 = sld [smem:[#allocation27_spill]]  ;;  %s4017_s23 = smov %s3122_s24 }
 0x609   : > { %s4015_s30 = sld [smem:[#allocation26_spill]] }
 0x60a   : > { %s4016_s25 = sld [smem:[#allocation28_spill]] }
 0x60e   : > { %p38_p5 = scmp.ge.s32.totalorder %s4014_s26, 4  }
 0x60f   : > { %s4018_s24 = smov %s4015_s30 }
 0x610   :  { %40 = sbr.rel (!%p38_p5) target bundleno = 25 (0x19), region = 199 }
 0x615   :  { %2157 = vsyncpa [#allocation4], 1 }
 0x616   :  { %2159 = vsyncpa [#allocation4 + $0x1], 1 }
 0x617   :  { %2160 = vsyncpa [#allocation7], 1 }
 0x618   :  { %2162 = vsyncpa [#allocation7 + $0x1], 1 }
 0x619   :  { %2163 = vsyncpa [#allocation10], 1 }
 0x61a   :  { %2165 = vsyncpa [#allocation10 + $0x1], 1 }
 0x61b   :  { %2166 = vsyncpa [#allocation13], 1 }
 0x61c   :  { %2167 = vsyncpa [#allocation16], 1 }
 0x61d   :  { %2168 = vsyncpa [#allocation5], 1 }
 0x61e   :  { %2170 = vsyncpa [#allocation5 + $0x1], 1 }

</bundles_post_ra>
